<compile_context>
chip_gen: v5e
topology: v5e:2x2
jax: 0.10.0
libtpu: 0.0.40
codegen_flags: <defaults>
</compile_context>

<pallas_src>
import math

import jax
import jax.numpy as jnp
from jax.experimental import pallas as pl
from jax.experimental.pallas import tpu as pltpu


OUT_LANES = 128  # lane-dense output padding (action_dim is tiny)


def _round_up(x, m):
    return (x + m - 1) // m * m


def _mish_kernel(x):
    # Mish(x) = x * tanh(softplus(x)) = x * n / (n + 2),  n = e^x (e^x + 2).
    # One exp (EUP) + one approx reciprocal (EUP) -> no VALU divide, no log/tanh.
    # Clamping the exponent at 20 is exact to f32 precision (limit is 1).
    e = jnp.exp(jnp.minimum(x, 20.0))
    n = e * (e + 2.0)
    return x * (n * pl.reciprocal(n + 2.0, approx=True))


def _mish_ref(x):
    # Host-side mirror of the same algebra (exact divide; pl.reciprocal is kernel-only).
    e = jnp.exp(jnp.minimum(x, 20.0))
    n = e * (e + 2.0)
    return x * (n / (n + 2.0))


# -----------------------------------------------------------------------------
# Pallas kernel (one batch row-tile per grid step; weights VMEM-resident)
# -----------------------------------------------------------------------------
def mlp_actor_kernel(ma_ref,                           # (1,1) SMEM scalar max_action
                     time_ref, x_ref, s_ref,           # (tb,1), (tb,A), (tb,S)
                     freq_ref,
                     wt1s_ref, wt1c_ref, bt1_ref,
                     wt2_ref, bt2_ref,
                     wm1x_ref, wm1t_ref, wm1s_ref, bm1_ref,
                     wm2_ref, bm2_ref,
                     wf_ref, bf_ref,
                     out_ref):
    f32 = jnp.float32
    bf16 = jnp.bfloat16
    max_action = ma_ref[0, 0]

    # --- SinusoidalPosEmb: emb = [sin(t*freq), cos(t*freq)] (f32 elementwise) --
    arg = time_ref[...] * freq_ref[...]                 # (tb, half)
    sn = jnp.sin(arg)
    cs = jnp.cos(arg)

    # --- time_mlp: Linear(t_dim, 2*t_dim) -> Mish -> Linear(2*t_dim, t_dim) ---
    # First linear's weight is split into sin-rows / cos-rows (no in-kernel
    # lane concatenation needed).
    h = (jnp.dot(sn.astype(bf16), wt1s_ref[...], preferred_element_type=f32)
         + jnp.dot(cs.astype(bf16), wt1c_ref[...], preferred_element_type=f32)
         + bt1_ref[...])
    h = _mish_kernel(h)
    t = jnp.dot(h.astype(bf16), wt2_ref[...], preferred_element_type=f32) + bt2_ref[...]

    # --- mid_layer: Linear(cat[x, t, state], 256) -> ReLU -> Linear(256,256) -> ReLU
    # torch.cat + Linear == three matmuls summed into one accumulator
    # (x, t, state each against their own weight-row slice) — numerically
    # identical to the PyTorch forward, and lets the wrapper skip the concat.
    m = (jnp.dot(x_ref[...].astype(bf16), wm1x_ref[...], preferred_element_type=f32)
         + jnp.dot(t.astype(bf16), wm1t_ref[...], preferred_element_type=f32)
         + jnp.dot(s_ref[...].astype(bf16), wm1s_ref[...], preferred_element_type=f32)
         + bm1_ref[...])
    # bf16 right after the ReLU: same bits the MXU would see anyway, half the
    # live (tb,256) intermediate -> less vreg pressure / spill traffic.
    m = jnp.maximum(m, 0.0).astype(bf16)
    m = jnp.dot(m, wm2_ref[...], preferred_element_type=f32) + bm2_ref[...]
    m = jnp.maximum(m, 0.0).astype(bf16)

    # --- final_layer + tanh scaling (lane-dense 128-wide padded bf16 output) ---
    y = jnp.dot(m, wf_ref[...], preferred_element_type=f32) + bf_ref[...]
    out_ref[...] = (max_action * jnp.tanh(y)).astype(out_ref.dtype)


# -----------------------------------------------------------------------------
# One-time weight preparation (bf16 cast, lane-dense final layer)
# -----------------------------------------------------------------------------
def prepare_kernel_params(params, action_dim):
    f32, bf16 = jnp.float32, jnp.bfloat16
    A = action_dim

    out_pad = _round_up(max(A, OUT_LANES), 128)
    # Columns beyond action_dim MUST stay exactly zero (they are sliced away;
    # tanh(0)*max_action == 0 keeps the padded lanes inert).
    wf_pad = jnp.zeros((params["wf"].shape[0], out_pad), f32).at[:, :A].set(params["wf"])
    bf_pad = jnp.zeros((1, out_pad), f32).at[:, :A].set(params["bf"])

    return dict(
        action_dim=A,
        out_pad=out_pad,
        freq=params["freq"].astype(f32),
        wt1_sin=params["wt1_sin"].astype(bf16),
        wt1_cos=params["wt1_cos"].astype(bf16),
        bt1=params["bt1"].astype(f32),
        wt2=params["wt2"].astype(bf16),
        bt2=params["bt2"].astype(f32),
        wm1_x=params["wm1_x"].astype(bf16),
        wm1_t=params["wm1_t"].astype(bf16),
        wm1_s=params["wm1_s"].astype(bf16),
        bm1=params["bm1"].astype(f32),
        wm2=params["wm2"].astype(bf16),
        bm2=params["bm2"].astype(f32),
        wf=wf_pad.astype(bf16),
        bf=bf_pad,
    )


# -----------------------------------------------------------------------------
# Wrapper
# -----------------------------------------------------------------------------
def mlp_actor_forward(kp, x, time, state, max_action, max_tile_b=512):
    """x: (B, action_dim), time: (B,), state: (B, state_dim) -> (B, action_dim).

    To amortize weight DMA / launch overhead, stack many env states or
    denoising rows along B and call this once: weights have constant
    index_maps (VMEM-resident across the whole grid) and only the activation
    row tiles stream. With the default tb=512, double-buffered activation /
    output tiles are still <2 MiB, fine on every generation.
    """
    B, A = x.shape
    S = state.shape[1]
    assert A == kp["action_dim"]
    out_pad = kp["out_pad"]
    f32 = jnp.float32

    # Batch row tile: multiple of 16 (native bf16 sublane tile for the output),
    # capped at max_tile_b. Bigger tiles -> fewer 0.35 us grid steps.
    tb = min(max_tile_b, _round_up(B, 16))
    Bp = _round_up(B, tb)

    # No concat, no zeros().at[].set(): a single pad per input only when needed.
    t_in = time.astype(f32).reshape(B, 1)
    x_in = x.astype(f32)
    s_in = state.astype(f32)
    if Bp != B:
        pad = ((0, Bp - B), (0, 0))
        t_in = jnp.pad(t_in, pad)
        x_in = jnp.pad(x_in, pad)
        s_in = jnp.pad(s_in, pad)
    ma = jnp.full((1, 1), max_action, f32)   # runtime SMEM scalar (no recompiles)

    weights = (kp["freq"],
               kp["wt1_sin"], kp["wt1_cos"], kp["bt1"],
               kp["wt2"], kp["bt2"],
               kp["wm1_x"], kp["wm1_t"], kp["wm1_s"], kp["bm1"],
               kp["wm2"], kp["bm2"],
               kp["wf"], kp["bf"])

    def row_spec(cols):
        return pl.BlockSpec((tb, cols), lambda i: (i, 0))

    def const_spec(arr):  # full-array block, pinned -> stays resident in VMEM
        return pl.BlockSpec(arr.shape, lambda i: (0, 0))

    out = pl.pallas_call(
        mlp_actor_kernel,
        # bf16 padded output: halves HBM writeback of the 42x-amplified padded
        # block; wrapper slices back to (B, A) and restores f32.
        out_shape=jax.ShapeDtypeStruct((Bp, out_pad), jnp.bfloat16),
        grid=(Bp // tb,),
        in_specs=[pl.BlockSpec(memory_space=pltpu.MemorySpace.SMEM),  # max_action
                  row_spec(1),                                        # time
                  row_spec(A),                                        # x
                  row_spec(S)]                                        # state
                 + [const_spec(w) for w in weights],
        out_specs=pl.BlockSpec((tb, out_pad), lambda i: (i, 0)),
        compiler_params=pltpu.CompilerParams(
            # Batch axis is data-parallel -> shardable across v7x's 2 TCs.
            dimension_semantics=(pltpu.PARALLEL,)),
    )(ma, t_in, x_in, s_in, *weights)

    return out[:B, :A].astype(f32)


# -----------------------------------------------------------------------------
# Deterministic parameter construction (synthetic init, no checkpoint load)
# -----------------------------------------------------------------------------
def init_params(key, state_dim, action_dim, t_dim=16):
    half = t_dim // 2
    emb_scale = math.log(10000.0) / (half - 1)
    freq = jnp.exp(jnp.arange(half, dtype=jnp.float32) * -emb_scale).reshape(1, half)

    def linear(key, fan_in, fan_out):
        kw, kb = jax.random.split(key)
        bound = 1.0 / math.sqrt(fan_in)
        w = jax.random.uniform(kw, (fan_in, fan_out), jnp.float32, -bound, bound)
        b = jax.random.uniform(kb, (1, fan_out), jnp.float32, -bound, bound)
        return w, b

    keys = jax.random.split(key, 5)
    wt1, bt1 = linear(keys[0], t_dim, 2 * t_dim)
    wt2, bt2 = linear(keys[1], 2 * t_dim, t_dim)
    input_dim = action_dim + t_dim + state_dim
    wm1, bm1 = linear(keys[2], input_dim, 256)
    wm2, bm2 = linear(keys[3], 256, 256)
    wf, bf = linear(keys[4], 256, action_dim)

    return dict(
        freq=freq,
        wt1_sin=wt1[:half], wt1_cos=wt1[half:], bt1=bt1,
        wt2=wt2, bt2=bt2,
        wm1_x=wm1[:action_dim],
        wm1_t=wm1[action_dim:action_dim + t_dim],
        wm1_s=wm1[action_dim + t_dim:],
        bm1=bm1,
        wm2=wm2, bm2=bm2,
        wf=wf, bf=bf,
    )


# -----------------------------------------------------------------------------
# References
# -----------------------------------------------------------------------------
def mlp_actor_reference(params, x, time, state, max_action):
    """Pure-f32 mirror of the PyTorch forward."""
    arg = time.reshape(-1, 1) * params["freq"]
    emb = jnp.concatenate([jnp.sin(arg), jnp.cos(arg)], axis=-1)
    wt1 = jnp.concatenate([params["wt1_sin"], params["wt1_cos"]], axis=0)
    h = emb @ wt1 + params["bt1"]
    h = h * jnp.tanh(jax.nn.softplus(h))
    t = h @ params["wt2"] + params["bt2"]
    cat = jnp.concatenate([x, t, state], axis=1)
    wm1 = jnp.concatenate([params["wm1_x"], params["wm1_t"], params["wm1_s"]], axis=0)
    m = jnp.maximum(cat @ wm1 + params["bm1"], 0.0)
    m = jnp.maximum(m @ params["wm2"] + params["bm2"], 0.0)
    return max_action * jnp.tanh(m @ params["wf"] + params["bf"])


def mlp_actor_mirror_reference(kp, x, time, state, max_action):
    """Mirror of the kernel's numerics (bf16 weights/MXU inputs, bf16 output),
    up to the kernel's approx-EUP reciprocal in Mish (exact divide here)."""
    f32, bf16 = jnp.float32, jnp.bfloat16

    def dot(a, w):
        return jnp.dot(a.astype(bf16), w, preferred_element_type=f32)

    arg = time.reshape(-1, 1).astype(f32) * kp["freq"]
    s, c = jnp.sin(arg), jnp.cos(arg)
    h = dot(s, kp["wt1_sin"]) + dot(c, kp["wt1_cos"]) + kp["bt1"]
    h = _mish_ref(h)
    t = dot(h, kp["wt2"]) + kp["bt2"]
    m = (dot(x.astype(f32), kp["wm1_x"]) + dot(t, kp["wm1_t"])
         + dot(state.astype(f32), kp["wm1_s"]) + kp["bm1"])
    m = jnp.maximum(m, 0.0)
    m = jnp.maximum(dot(m, kp["wm2"]) + kp["bm2"], 0.0)
    y = dot(m, kp["wf"]) + kp["bf"]
    out = (max_action * jnp.tanh(y)).astype(bf16).astype(f32)   # match bf16 output
    return out[:, :x.shape[1]]


# -----------------------------------------------------------------------------
if __name__ == "__main__":
    B = 2
    state_dim = 11
    action_dim = 3
    t_dim = 16
    max_action = 1.0

    key = jax.random.PRNGKey(0)
    kparam, kx, kt, ks = jax.random.split(key, 4)

    params = init_params(kparam, state_dim, action_dim, t_dim)
    kernel_params = prepare_kernel_params(params, action_dim)

    x = jax.random.normal(kx, (B, action_dim), jnp.float32)       # noisy action
    time = jax.random.uniform(kt, (B,), jnp.float32, 0.0, 100.0)  # diffusion timestep
    state = jax.random.normal(ks, (B, state_dim), jnp.float32)    # observation

    out = mlp_actor_forward(kernel_params, x, time, state, max_action)
    out = jax.block_until_ready(out)
    assert out.shape == (B, action_dim)

    # Tight check against a reference with (near-)identical bf16/f32 numerics
    # (validates kernel plumbing: tiling, weight splits, padding, activations).
    # Tolerance covers the in-kernel approx reciprocal + bf16 output rounding.
    mirror = mlp_actor_mirror_reference(kernel_params, x, time, state, max_action)
    assert jnp.allclose(out, mirror, atol=1e-2, rtol=1e-2), "mismatch vs bf16 mirror reference"

    # Loose check against the pure-f32 PyTorch-equivalent forward
    # (difference bounded by bf16 weight/activation/output quantization).
    ref = mlp_actor_reference(params, x, time, state, max_action)
    assert jnp.allclose(out, ref, atol=1e-1, rtol=1e-1), "mismatch vs f32 reference beyond bf16 tolerance"

    print("KERNEL_OK")
</pallas_src>

<mosaic_0001>
module attributes {stable_mosaic.version = 11 : i64} {
  func.func @mlp_actor_kernel(%arg0: i32, %arg1: memref<1x1xf32, #tpu.memory_space<smem>>, %arg2: memref<16x1xf32, #tpu.memory_space<vmem>>, %arg3: memref<16x3xf32, #tpu.memory_space<vmem>>, %arg4: memref<16x11xf32, #tpu.memory_space<vmem>>, %arg5: memref<1x8xf32, #tpu.memory_space<vmem>>, %arg6: memref<8x32xbf16, #tpu.memory_space<vmem>>, %arg7: memref<8x32xbf16, #tpu.memory_space<vmem>>, %arg8: memref<1x32xf32, #tpu.memory_space<vmem>>, %arg9: memref<32x16xbf16, #tpu.memory_space<vmem>>, %arg10: memref<1x16xf32, #tpu.memory_space<vmem>>, %arg11: memref<3x256xbf16, #tpu.memory_space<vmem>>, %arg12: memref<16x256xbf16, #tpu.memory_space<vmem>>, %arg13: memref<11x256xbf16, #tpu.memory_space<vmem>>, %arg14: memref<1x256xf32, #tpu.memory_space<vmem>>, %arg15: memref<256x256xbf16, #tpu.memory_space<vmem>>, %arg16: memref<1x256xf32, #tpu.memory_space<vmem>>, %arg17: memref<256x128xbf16, #tpu.memory_space<vmem>>, %arg18: memref<1x128xf32, #tpu.memory_space<vmem>>, %arg19: memref<16x128xbf16, #tpu.memory_space<vmem>>) attributes {dimension_semantics = [#tpu.dimension_semantics<parallel>], iteration_bounds = array<i64: 1>, scalar_prefetch = 0 : i64, scratch_operands = 0 : i64, tpu.core_type = #tpu.core_type<tc>, window_params = [{transform_indices = @transform_0, window_bounds = array<i64: 1, 1>}, {transform_indices = @transform_1, window_bounds = array<i64: 16, 1>}, {transform_indices = @transform_2, window_bounds = array<i64: 16, 3>}, {transform_indices = @transform_3, window_bounds = array<i64: 16, 11>}, {pipeline_mode = #tpu.pipeline_mode<synchronous>, transform_indices = @transform_4, window_bounds = array<i64: 1, 8>}, {pipeline_mode = #tpu.pipeline_mode<synchronous>, transform_indices = @transform_5, window_bounds = array<i64: 8, 32>}, {pipeline_mode = #tpu.pipeline_mode<synchronous>, transform_indices = @transform_6, window_bounds = array<i64: 8, 32>}, {pipeline_mode = #tpu.pipeline_mode<synchronous>, transform_indices = @transform_7, window_bounds = array<i64: 1, 32>}, {pipeline_mode = #tpu.pipeline_mode<synchronous>, transform_indices = @transform_8, window_bounds = array<i64: 32, 16>}, {pipeline_mode = #tpu.pipeline_mode<synchronous>, transform_indices = @transform_9, window_bounds = array<i64: 1, 16>}, {pipeline_mode = #tpu.pipeline_mode<synchronous>, transform_indices = @transform_10, window_bounds = array<i64: 3, 256>}, {pipeline_mode = #tpu.pipeline_mode<synchronous>, transform_indices = @transform_11, window_bounds = array<i64: 16, 256>}, {pipeline_mode = #tpu.pipeline_mode<synchronous>, transform_indices = @transform_12, window_bounds = array<i64: 11, 256>}, {pipeline_mode = #tpu.pipeline_mode<synchronous>, transform_indices = @transform_13, window_bounds = array<i64: 1, 256>}, {pipeline_mode = #tpu.pipeline_mode<synchronous>, transform_indices = @transform_14, window_bounds = array<i64: 256, 256>}, {pipeline_mode = #tpu.pipeline_mode<synchronous>, transform_indices = @transform_15, window_bounds = array<i64: 1, 256>}, {pipeline_mode = #tpu.pipeline_mode<synchronous>, transform_indices = @transform_16, window_bounds = array<i64: 256, 128>}, {pipeline_mode = #tpu.pipeline_mode<synchronous>, transform_indices = @transform_17, window_bounds = array<i64: 1, 128>}, {transform_indices = @transform_18, window_bounds = array<i64: 16, 128>}]} {
    %c0 = arith.constant 0 : index
    %c0_0 = arith.constant 0 : index
    %0 = memref.load %arg1[%c0, %c0_0] : memref<1x1xf32, #tpu.memory_space<smem>>
    %c0_1 = arith.constant 0 : index
    %c0_2 = arith.constant 0 : index
    %1 = vector.load %arg2[%c0_1, %c0_2] : memref<16x1xf32, #tpu.memory_space<vmem>>, vector<16x1xf32>
    %c0_3 = arith.constant 0 : index
    %c0_4 = arith.constant 0 : index
    %2 = vector.load %arg5[%c0_3, %c0_4] : memref<1x8xf32, #tpu.memory_space<vmem>>, vector<1x8xf32>
    %3 = vector.broadcast %1 : vector<16x1xf32> to vector<16x8xf32>
    %4 = vector.broadcast %2 : vector<1x8xf32> to vector<16x8xf32>
    %5 = arith.mulf %3, %4 : vector<16x8xf32>
    %6 = math.sin %5 : vector<16x8xf32>
    %7 = math.cos %5 : vector<16x8xf32>
    %8 = arith.truncf %6 : vector<16x8xf32> to vector<16x8xbf16>
    %c0_5 = arith.constant 0 : index
    %c0_6 = arith.constant 0 : index
    %9 = vector.load %arg6[%c0_5, %c0_6] : memref<8x32xbf16, #tpu.memory_space<vmem>>, vector<8x32xbf16>
    %cst = arith.constant dense<0.000000e+00> : vector<16x32xf32>
    %10 = tpu.matmul %8, %9, %cst {dimension_numbers = #tpu.dot_dimension_numbers<[1], [0], [0], [1], [0, 0, 1, 1], [], []>} : vector<16x8xbf16>, vector<8x32xbf16>, vector<16x32xf32> -> vector<16x32xf32>
    %11 = arith.truncf %7 : vector<16x8xf32> to vector<16x8xbf16>
    %c0_7 = arith.constant 0 : index
    %c0_8 = arith.constant 0 : index
    %12 = vector.load %arg7[%c0_7, %c0_8] : memref<8x32xbf16, #tpu.memory_space<vmem>>, vector<8x32xbf16>
    %cst_9 = arith.constant dense<0.000000e+00> : vector<16x32xf32>
    %13 = tpu.matmul %11, %12, %cst_9 {dimension_numbers = #tpu.dot_dimension_numbers<[1], [0], [0], [1], [0, 0, 1, 1], [], []>} : vector<16x8xbf16>, vector<8x32xbf16>, vector<16x32xf32> -> vector<16x32xf32>
    %14 = arith.addf %10, %13 : vector<16x32xf32>
    %c0_10 = arith.constant 0 : index
    %c0_11 = arith.constant 0 : index
    %15 = vector.load %arg8[%c0_10, %c0_11] : memref<1x32xf32, #tpu.memory_space<vmem>>, vector<1x32xf32>
    %16 = vector.broadcast %15 : vector<1x32xf32> to vector<16x32xf32>
    %17 = arith.addf %14, %16 : vector<16x32xf32>
    %cst_12 = arith.constant 2.000000e+01 : f32
    %18 = vector.broadcast %cst_12 : f32 to vector<16x32xf32>
    %19 = arith.minimumf %17, %18 : vector<16x32xf32>
    %20 = math.exp %19 : vector<16x32xf32>
    %cst_13 = arith.constant 2.000000e+00 : f32
    %21 = vector.broadcast %cst_13 : f32 to vector<16x32xf32>
    %22 = arith.addf %20, %21 : vector<16x32xf32>
    %23 = arith.mulf %20, %22 : vector<16x32xf32>
    %cst_14 = arith.constant 2.000000e+00 : f32
    %24 = vector.broadcast %cst_14 : f32 to vector<16x32xf32>
    %25 = arith.addf %23, %24 : vector<16x32xf32>
    %26 = tpu.reciprocal %25 {approx = true} : vector<16x32xf32> -> vector<16x32xf32>
    %27 = arith.mulf %23, %26 : vector<16x32xf32>
    %28 = arith.mulf %17, %27 : vector<16x32xf32>
    %29 = arith.truncf %28 : vector<16x32xf32> to vector<16x32xbf16>
    %c0_15 = arith.constant 0 : index
    %c0_16 = arith.constant 0 : index
    %30 = vector.load %arg9[%c0_15, %c0_16] : memref<32x16xbf16, #tpu.memory_space<vmem>>, vector<32x16xbf16>
    %cst_17 = arith.constant dense<0.000000e+00> : vector<16x16xf32>
    %31 = tpu.matmul %29, %30, %cst_17 {dimension_numbers = #tpu.dot_dimension_numbers<[1], [0], [0], [1], [0, 0, 1, 1], [], []>} : vector<16x32xbf16>, vector<32x16xbf16>, vector<16x16xf32> -> vector<16x16xf32>
    %c0_18 = arith.constant 0 : index
    %c0_19 = arith.constant 0 : index
    %32 = vector.load %arg10[%c0_18, %c0_19] : memref<1x16xf32, #tpu.memory_space<vmem>>, vector<1x16xf32>
    %33 = vector.broadcast %32 : vector<1x16xf32> to vector<16x16xf32>
    %34 = arith.addf %31, %33 : vector<16x16xf32>
    %c0_20 = arith.constant 0 : index
    %c0_21 = arith.constant 0 : index
    %35 = vector.load %arg3[%c0_20, %c0_21] : memref<16x3xf32, #tpu.memory_space<vmem>>, vector<16x3xf32>
    %36 = arith.truncf %35 : vector<16x3xf32> to vector<16x3xbf16>
    %c0_22 = arith.constant 0 : index
    %c0_23 = arith.constant 0 : index
    %37 = vector.load %arg11[%c0_22, %c0_23] : memref<3x256xbf16, #tpu.memory_space<vmem>>, vector<3x256xbf16>
    %cst_24 = arith.constant dense<0.000000e+00> : vector<16x256xf32>
    %38 = tpu.matmul %36, %37, %cst_24 {dimension_numbers = #tpu.dot_dimension_numbers<[1], [0], [0], [1], [0, 0, 1, 1], [], []>} : vector<16x3xbf16>, vector<3x256xbf16>, vector<16x256xf32> -> vector<16x256xf32>
    %39 = arith.truncf %34 : vector<16x16xf32> to vector<16x16xbf16>
    %c0_25 = arith.constant 0 : index
    %c0_26 = arith.constant 0 : index
    %40 = vector.load %arg12[%c0_25, %c0_26] : memref<16x256xbf16, #tpu.memory_space<vmem>>, vector<16x256xbf16>
    %cst_27 = arith.constant dense<0.000000e+00> : vector<16x256xf32>
    %41 = tpu.matmul %39, %40, %cst_27 {dimension_numbers = #tpu.dot_dimension_numbers<[1], [0], [0], [1], [0, 0, 1, 1], [], []>} : vector<16x16xbf16>, vector<16x256xbf16>, vector<16x256xf32> -> vector<16x256xf32>
    %42 = arith.addf %38, %41 : vector<16x256xf32>
    %c0_28 = arith.constant 0 : index
    %c0_29 = arith.constant 0 : index
    %43 = vector.load %arg4[%c0_28, %c0_29] : memref<16x11xf32, #tpu.memory_space<vmem>>, vector<16x11xf32>
    %44 = arith.truncf %43 : vector<16x11xf32> to vector<16x11xbf16>
    %c0_30 = arith.constant 0 : index
    %c0_31 = arith.constant 0 : index
    %45 = vector.load %arg13[%c0_30, %c0_31] : memref<11x256xbf16, #tpu.memory_space<vmem>>, vector<11x256xbf16>
    %cst_32 = arith.constant dense<0.000000e+00> : vector<16x256xf32>
    %46 = tpu.matmul %44, %45, %cst_32 {dimension_numbers = #tpu.dot_dimension_numbers<[1], [0], [0], [1], [0, 0, 1, 1], [], []>} : vector<16x11xbf16>, vector<11x256xbf16>, vector<16x256xf32> -> vector<16x256xf32>
    %47 = arith.addf %42, %46 : vector<16x256xf32>
    %c0_33 = arith.constant 0 : index
    %c0_34 = arith.constant 0 : index
    %48 = vector.load %arg14[%c0_33, %c0_34] : memref<1x256xf32, #tpu.memory_space<vmem>>, vector<1x256xf32>
    %49 = vector.broadcast %48 : vector<1x256xf32> to vector<16x256xf32>
    %50 = arith.addf %47, %49 : vector<16x256xf32>
    %cst_35 = arith.constant 0.000000e+00 : f32
    %51 = vector.broadcast %cst_35 : f32 to vector<16x256xf32>
    %52 = arith.maximumf %50, %51 : vector<16x256xf32>
    %53 = arith.truncf %52 : vector<16x256xf32> to vector<16x256xbf16>
    %c0_36 = arith.constant 0 : index
    %c0_37 = arith.constant 0 : index
    %54 = vector.load %arg15[%c0_36, %c0_37] : memref<256x256xbf16, #tpu.memory_space<vmem>>, vector<256x256xbf16>
    %cst_38 = arith.constant dense<0.000000e+00> : vector<16x256xf32>
    %55 = tpu.matmul %53, %54, %cst_38 {dimension_numbers = #tpu.dot_dimension_numbers<[1], [0], [0], [1], [0, 0, 1, 1], [], []>} : vector<16x256xbf16>, vector<256x256xbf16>, vector<16x256xf32> -> vector<16x256xf32>
    %c0_39 = arith.constant 0 : index
    %c0_40 = arith.constant 0 : index
    %56 = vector.load %arg16[%c0_39, %c0_40] : memref<1x256xf32, #tpu.memory_space<vmem>>, vector<1x256xf32>
    %57 = vector.broadcast %56 : vector<1x256xf32> to vector<16x256xf32>
    %58 = arith.addf %55, %57 : vector<16x256xf32>
    %cst_41 = arith.constant 0.000000e+00 : f32
    %59 = vector.broadcast %cst_41 : f32 to vector<16x256xf32>
    %60 = arith.maximumf %58, %59 : vector<16x256xf32>
    %61 = arith.truncf %60 : vector<16x256xf32> to vector<16x256xbf16>
    %c0_42 = arith.constant 0 : index
    %c0_43 = arith.constant 0 : index
    %62 = vector.load %arg17[%c0_42, %c0_43] : memref<256x128xbf16, #tpu.memory_space<vmem>>, vector<256x128xbf16>
    %cst_44 = arith.constant dense<0.000000e+00> : vector<16x128xf32>
    %63 = tpu.matmul %61, %62, %cst_44 {dimension_numbers = #tpu.dot_dimension_numbers<[1], [0], [0], [1], [0, 0, 1, 1], [], []>} : vector<16x256xbf16>, vector<256x128xbf16>, vector<16x128xf32> -> vector<16x128xf32>
    %c0_45 = arith.constant 0 : index
    %c0_46 = arith.constant 0 : index
    %64 = vector.load %arg18[%c0_45, %c0_46] : memref<1x128xf32, #tpu.memory_space<vmem>>, vector<1x128xf32>
    %65 = vector.broadcast %64 : vector<1x128xf32> to vector<16x128xf32>
    %66 = arith.addf %63, %65 : vector<16x128xf32>
    %67 = math.tanh %66 : vector<16x128xf32>
    %68 = vector.broadcast %0 : f32 to vector<16x128xf32>
    %69 = arith.mulf %68, %67 : vector<16x128xf32>
    %70 = arith.truncf %69 : vector<16x128xf32> to vector<16x128xbf16>
    %c0_47 = arith.constant 0 : index
    %c0_48 = arith.constant 0 : index
    %71 = vector.load %arg19[%c0_47, %c0_48] : memref<16x128xbf16, #tpu.memory_space<vmem>>, vector<16x128xbf16>
    tpu.vector_store %arg19[%c0_47, %c0_48], %70 {strides = array<i32>} : memref<16x128xbf16, #tpu.memory_space<vmem>>, vector<16x128xbf16>,
    return
  }
  func.func @transform_0(%arg0: i32) -> (i32, i32) {
    %c0_i32 = arith.constant 0 : i32
    %c0_i32_0 = arith.constant 0 : i32
    %c0_i32_1 = arith.constant 0 : i32
    return %c0_i32, %c0_i32_0 : i32, i32
  }
  func.func @transform_1(%arg0: i32) -> (i32, i32) {
    %c0_i32 = arith.constant 0 : i32
    %c0_i32_0 = arith.constant 0 : i32
    return %arg0, %c0_i32 : i32, i32
  }
  func.func @transform_2(%arg0: i32) -> (i32, i32) {
    %c0_i32 = arith.constant 0 : i32
    %c0_i32_0 = arith.constant 0 : i32
    return %arg0, %c0_i32 : i32, i32
  }
  func.func @transform_3(%arg0: i32) -> (i32, i32) {
    %c0_i32 = arith.constant 0 : i32
    %c0_i32_0 = arith.constant 0 : i32
    return %arg0, %c0_i32 : i32, i32
  }
  func.func @transform_4(%arg0: i32) -> (i32, i32) {
    %c0_i32 = arith.constant 0 : i32
    %c0_i32_0 = arith.constant 0 : i32
    %c0_i32_1 = arith.constant 0 : i32
    return %c0_i32, %c0_i32_0 : i32, i32
  }
  func.func @transform_5(%arg0: i32) -> (i32, i32) {
    %c0_i32 = arith.constant 0 : i32
    %c0_i32_0 = arith.constant 0 : i32
    %c0_i32_1 = arith.constant 0 : i32
    return %c0_i32, %c0_i32_0 : i32, i32
  }
  func.func @transform_6(%arg0: i32) -> (i32, i32) {
    %c0_i32 = arith.constant 0 : i32
    %c0_i32_0 = arith.constant 0 : i32
    %c0_i32_1 = arith.constant 0 : i32
    return %c0_i32, %c0_i32_0 : i32, i32
  }
  func.func @transform_7(%arg0: i32) -> (i32, i32) {
    %c0_i32 = arith.constant 0 : i32
    %c0_i32_0 = arith.constant 0 : i32
    %c0_i32_1 = arith.constant 0 : i32
    return %c0_i32, %c0_i32_0 : i32, i32
  }
  func.func @transform_8(%arg0: i32) -> (i32, i32) {
    %c0_i32 = arith.constant 0 : i32
    %c0_i32_0 = arith.constant 0 : i32
    %c0_i32_1 = arith.constant 0 : i32
    return %c0_i32, %c0_i32_0 : i32, i32
  }
  func.func @transform_9(%arg0: i32) -> (i32, i32) {
    %c0_i32 = arith.constant 0 : i32
    %c0_i32_0 = arith.constant 0 : i32
    %c0_i32_1 = arith.constant 0 : i32
    return %c0_i32, %c0_i32_0 : i32, i32
  }
  func.func @transform_10(%arg0: i32) -> (i32, i32) {
    %c0_i32 = arith.constant 0 : i32
    %c0_i32_0 = arith.constant 0 : i32
    %c0_i32_1 = arith.constant 0 : i32
    return %c0_i32, %c0_i32_0 : i32, i32
  }
  func.func @transform_11(%arg0: i32) -> (i32, i32) {
    %c0_i32 = arith.constant 0 : i32
    %c0_i32_0 = arith.constant 0 : i32
    %c0_i32_1 = arith.constant 0 : i32
    return %c0_i32, %c0_i32_0 : i32, i32
  }
  func.func @transform_12(%arg0: i32) -> (i32, i32) {
    %c0_i32 = arith.constant 0 : i32
    %c0_i32_0 = arith.constant 0 : i32
    %c0_i32_1 = arith.constant 0 : i32
    return %c0_i32, %c0_i32_0 : i32, i32
  }
  func.func @transform_13(%arg0: i32) -> (i32, i32) {
    %c0_i32 = arith.constant 0 : i32
    %c0_i32_0 = arith.constant 0 : i32
    %c0_i32_1 = arith.constant 0 : i32
    return %c0_i32, %c0_i32_0 : i32, i32
  }
  func.func @transform_14(%arg0: i32) -> (i32, i32) {
    %c0_i32 = arith.constant 0 : i32
    %c0_i32_0 = arith.constant 0 : i32
    %c0_i32_1 = arith.constant 0 : i32
    return %c0_i32, %c0_i32_0 : i32, i32
  }
  func.func @transform_15(%arg0: i32) -> (i32, i32) {
    %c0_i32 = arith.constant 0 : i32
    %c0_i32_0 = arith.constant 0 : i32
    %c0_i32_1 = arith.constant 0 : i32
    return %c0_i32, %c0_i32_0 : i32, i32
  }
  func.func @transform_16(%arg0: i32) -> (i32, i32) {
    %c0_i32 = arith.constant 0 : i32
    %c0_i32_0 = arith.constant 0 : i32
    %c0_i32_1 = arith.constant 0 : i32
    return %c0_i32, %c0_i32_0 : i32, i32
  }
  func.func @transform_17(%arg0: i32) -> (i32, i32) {
    %c0_i32 = arith.constant 0 : i32
    %c0_i32_0 = arith.constant 0 : i32
    %c0_i32_1 = arith.constant 0 : i32
    return %c0_i32, %c0_i32_0 : i32, i32
  }
  func.func @transform_18(%arg0: i32) -> (i32, i32) {
    %c0_i32 = arith.constant 0 : i32
    %c0_i32_0 = arith.constant 0 : i32
    return %arg0, %c0_i32 : i32, i32
  }
}

</mosaic_0001>

<bundles_post_ra>
// kernel: tpu_custom_call.1
= control target key start
LH: loop header
LB: loop body
LE: loop exit
PB: predicated region body
PF: predicated region fallthrough
CT: control target
= control target key end

     0   :  { %s2349_s0 = inlined_call_operand.<no memory space> [shape: f32[1,1], index: 0, kind: input, shape index: {}]   ;;  %s2350_s1 = inlined_call_operand.vmem [shape: f32[16,1], index: 1, kind: input, shape index: {}]   ;;  %s2351_s2 = inlined_call_operand.vmem [shape: f32[16,3], index: 2, kind: input, shape index: {}]   ;;  %s2352_s3 = inlined_call_operand.vmem [shape: f32[16,11], index: 3, kind: input, shape index: {}]   ;;  %s2353_s4 = inlined_call_operand.vmem [shape: f32[1,8], index: 4, kind: input, shape index: {}]   ;;  %s2354_s5 = inlined_call_operand.vmem [shape: bf16[8,32], index: 5, kind: input, shape index: {}]   ;;  %s2355_s6 = inlined_call_operand.hbm [shape: bf16[8,32], index: 6, kind: input, shape index: {}]   ;;  %s2356_s7 = inlined_call_operand.hbm [shape: f32[1,32], index: 7, kind: input, shape index: {}]   ;;  %s2357_s8 = inlined_call_operand.vmem [shape: bf16[32,16], index: 8, kind: input, shape index: {}]   ;;  %s2358_s9 = inlined_call_operand.hbm [shape: f32[1,16], index: 9, kind: input, shape index: {}]   ;;  %s2359_s10 = inlined_call_operand.vmem [shape: bf16[3,256], index: 10, kind: input, shape index: {}]   ;;  %s2360_s11 = inlined_call_operand.vmem [shape: bf16[16,256], index: 11, kind: input, shape index: {}]   ;;  %s2361_s12 = inlined_call_operand.vmem [shape: bf16[11,256], index: 12, kind: input, shape index: {}]   ;;  %s2362_s13 = inlined_call_operand.vmem [shape: f32[1,256], index: 13, kind: input, shape index: {}]   ;;  %s2363_s14 = inlined_call_operand.hbm [shape: bf16[256,256], index: 14, kind: input, shape index: {}]   ;;  %s2364_s15 = inlined_call_operand.vmem [shape: f32[1,256], index: 15, kind: input, shape index: {}]   ;;  %s2365_s16 = inlined_call_operand.hbm [shape: bf16[256,128], index: 16, kind: input, shape index: {}]   ;;  %s2366_s17 = inlined_call_operand.vmem [shape: f32[1,128], index: 17, kind: input, shape index: {}]   ;;  %s2367_s18 = inlined_call_operand.hbm [shape: bf16[16,128], index: 18, kind: output, shape index: {}]  }
   0x1   :  { %2370 = sst [smem:[#allocation17_spill]] %s2349_s0 }
   0x2   :  { %2371 = sst [smem:[#allocation18_spill]] %s2350_s1 }
   0x3   :  { %2372 = sst [smem:[#allocation19_spill]] %s2351_s2 }
   0x4   :  { %24 = vsyncpa [#allocation4], 0 }
   0x5   :  { %25 = vsyncpa [#allocation7], 0 }
   0x6   :  { %26 = vsyncpa [#allocation10], 0  ;;  %s56_s29 = sshll.u32 %s2356_s7, 4  ;;  %s57_s29 = int_to_ptr.hbm [resolvable:$true] %s56_s29 }
   0x7   :  { %27 = vsyncpa [#allocation5], 0  ;;  %s1981_s30 = smov [#allocation6]   ;;  %s87_s20 = sshll.u32 %s2363_s14, 4  ;;  %s88_s20 = int_to_ptr.hbm [resolvable:$true] %s87_s20 }
   0x8   :  { %s58_s0 = sshll.u32 %s1981_s30, 4  ;;  %s1982_s21 = smov [#allocation9]   ;;  %s59_s0 = int_to_ptr.vmem [resolvable:$true] %s58_s0 }
   0x9   :  { %61 = dma.hbm_to_vmem [thread:$0]  %s57_s29, 16, %s59_s0, [#allocation7]  }
   0xa   :  { %s89_s22 = sshll.u32 %s1982_s21, 4  ;;  %s1983_s2 = smov 128   ;;  %s90_s22 = int_to_ptr.vmem [resolvable:$true] %s89_s22 }
   0xb   :  { %s1984_s23 = smov 8   ;;  %s45_s7 = sshll.u32 %s2355_s6, 4  ;;  %s46_s7 = int_to_ptr.hbm [resolvable:$true] %s45_s7 }
   0xc   :  { %95 = dma.hbm_to_vmem [thread:$0]  %s88_s20, 4096, %s90_s22, [#allocation10], %s1983_s2, %s1983_s2, %s1984_s23  }
   0xd   :  { %s1985_s26 = smov [#allocation3]   ;;  %s69_s14 = sshll.u32 %s2358_s9, 4  ;;  %s70_s14 = int_to_ptr.hbm [resolvable:$true] %s69_s14 }
   0xe   :  { %s47_s27 = sshll.u32 %s1985_s26, 4  ;;  %s1986_s29 = smov [#allocation8]   ;;  %s48_s27 = int_to_ptr.vmem [resolvable:$true] %s47_s27 }
   0xf   :  { %50 = dma.hbm_to_vmem [thread:$0]  %s46_s7, 64, %s48_s27, [#allocation4]  }
  0x10   :  { %s71_s0 = sshll.u32 %s1986_s29, 4  ;;  %s102_s20 = sshll.u32 %s2365_s16, 4  ;;  %s72_s0 = int_to_ptr.vmem [resolvable:$true] %s71_s0  ;;  %s103_s20 = int_to_ptr.hbm [resolvable:$true] %s102_s20 }
  0x11   :  { %74 = dma.hbm_to_vmem [thread:$0]  %s70_s14, 16, %s72_s0, [#allocation7]  }
  0x12   :  { %s1987_s6 = smov [#allocation11]   ;;  %s1988_s22 = smov 64  }
  0x13   :  { %s104_s21 = sshll.u32 %s1987_s6, 4  ;;  %s1989_s2 = smov 4   ;;  %s105_s21 = int_to_ptr.vmem [resolvable:$true] %s104_s21 }
  0x14   :  { %110 = dma.hbm_to_vmem [thread:$0]  %s103_s20, 2048, %s105_s21, [#allocation10], %s1988_s22, %s1988_s22, %s1989_s2  }
  0x15   :  { %1973 = dma.done.wait [#allocation4], 64  }
  0x16   :  { %1974 = vsyncadd [#allocation4], 4294967232 }
  0x17   :  { %1975 = dma.done.wait [#allocation7], 32  }
  0x18   :  { %1976 = vsyncadd [#allocation7], 4294967264 }
  0x19   :  { %1977 = dma.done.wait [#allocation10], 6144  }
  0x1a   :  { %1978 = vsyncadd [#allocation10], 4294961152  ;;  %v1990_v0 = vmov 0   ;;  %s2373_s23 = sld [smem:[#allocation18_spill]]  ;;  %v1813_v3 = vld [vmem:[%s2353_s4] ss:$0 sm:$0xff] }
  0x1b   :  { %1812 = vset.pattern.permute.xlu0 %v1990_v0  ;;  %v1991_v25 = vmov 683565275   ;;  %v1992_v27 = vmov 2475754826   ;;  %v1993_v29 = vmov 2131351028  }
  0x1c   :  { %v1994_v31 = vmov 2102212464   ;;  %v1995_v36 = vmov 920167782   ;;  %v1996_v39 = vmov 1326507024  }
  0x1d   :  { %s2378_s14 = sld [smem:[#allocation19_spill]]  ;;  %s1998_s16 = smov [#allocation12]  }
  0x1e   :  { %s2379_s9 = sld [smem:[#allocation17_spill]]  ;;  %s1483_s25 = sshll.u32 %s2367_s18, 4  ;;  %s1484_s25 = int_to_ptr.hbm [resolvable:$true] %s1483_s25 }
  0x20   :  { %v135_v1 = vld [vmem:[%s2373_s23] sm:$0xff]  ;;  %v136_v2 = vld [vmem:[%s2373_s23 + $0x8] sm:$0xff]  ;;  %s1481_s23 = sshll.u32 %s1998_s16, 4  ;;  %s1482_s23 = int_to_ptr.vmem [resolvable:$true] %s1481_s23 }
  0x21   :  { %140 = vperm.xlu0 %1812, %v135_v1  }
  0x29   :  { %145 = vperm.xlu0 %1812, %v136_v2  }
  0x93   :  { %v141_v4 = vpop.permute.xlu0 %140 }
  0x94   :  { %v2122_v5 = vmul.f32 %v1813_v3, %v141_v4 }
  0x96   :  { %v153_v6 = vand.u32 2147483647, %v2122_v5  ;;  %v156_v7 = vand.u32 2139095040, %v2122_v5 }
  0x98   :  { %v157_v8 = vshrl.u32 %v156_v7, 23  ;;  %v160_v9 = vand.u32 8388607, %v153_v6 }
  0x9a   :  { %v1498_v10 = vadd.s32 4294967169, %v157_v8  ;;  %v161_v11 = vor.u32 8388608, %v160_v9 }
  0x9b   :  { %v146_v12 = vpop.permute.xlu0 %145 }
  0x9c   :  { %v163_v13 = vadd.s32 1, %v1498_v10  ;;  %v2128_v14 = vmul.f32 %v1813_v3, %v146_v12  ;;  %v2130_v15 = vshll.u32 %v161_v11, 8 }
  0x9e   :  { %vm164_vm0 = vcmp.gt.s32.totalorder %v163_v13, 0  ;;  %v308_v16 = vand.u32 2147483647, %v2128_v14  ;;  %v311_v18 = vand.u32 2139095040, %v2128_v14  ;;  %v202_v22 = vand.u32 65535, %v2130_v15 }
  0x9f   :  { %v165_v17 = vsel %vm164_vm0, %v163_v13, 0  ;;  %v203_v61 = vshrl.u32 %v2130_v15, 16 }
  0xa0   :  { %v167_v19 = vand.u32 31, %v165_v17  ;;  %v166_v20 = vshrl.u32 %v165_v17, 5  ;;  %v312_v23 = vshrl.u32 %v311_v18, 23  ;;  %v315_v24 = vand.u32 8388607, %v308_v16 }
  0xa2   :  { %v168_v21 = vsub.s32 32, %v167_v19  ;;  %v170_v26 = vshll.u32 %v1991_v25, %v167_v19  ;;  %v173_v28 = vshll.u32 %v1992_v27, %v167_v19  ;;  %v176_v30 = vshll.u32 %v1993_v29, %v167_v19 }
  0xa3   :  { %v179_v32 = vshll.u32 %v1994_v31, %v167_v19  ;;  %v182_v37 = vshll.u32 %v1995_v36, %v167_v19  ;;  %vm185_vm1 = vcmp.lt.s32.totalorder %v166_v20, 1  ;;  %vm186_vm2 = vcmp.lt.s32.totalorder %v166_v20, 2 }
  0xa4   :  { %v171_v33 = vshrl.u32 %v1992_v27, %v168_v21  ;;  %v174_v34 = vshrl.u32 %v1993_v29, %v168_v21  ;;  %v177_v35 = vshrl.u32 %v1994_v31, %v168_v21  ;;  %v180_v38 = vshrl.u32 %v1995_v36, %v168_v21 }
  0xa5   :  { %v183_v40 = vshrl.u32 %v1996_v39, %v168_v21  ;;  %v1501_v44 = vadd.s32 4294967169, %v312_v23  ;;  %v169_v45 = vshrl.u32 %v1991_v25, %v168_v21  ;;  %vm188_vm3 = vcmp.lt.s32.totalorder %v166_v20, 4 }
  0xa6   :  { %v172_v41 = vor.u32 %v171_v33, %v170_v26  ;;  %v175_v42 = vor.u32 %v174_v34, %v173_v28  ;;  %v178_v43 = vor.u32 %v177_v35, %v176_v30  ;;  %v181_v46 = vor.u32 %v180_v38, %v179_v32 }
  0xa7   :  { %v184_v47 = vor.u32 %v183_v40, %v182_v37  ;;  %vm187_vm4 = vcmp.lt.s32.totalorder %v166_v20, 3  ;;  %v316_v53 = vor.u32 8388608, %v315_v24  ;;  %v318_v54 = vadd.s32 1, %v1501_v44 }
  0xa8   :  { %v190_v48 = vsel %vm188_vm3, %v178_v43, 2102212464  ;;  %v193_v49 = vsel %vm185_vm1, %v172_v41, %v175_v42  ;;  %v197_v50 = vsel %vm185_vm1, %v175_v42, %v178_v43  ;;  %v194_v51 = vsel %vm188_vm3, %v181_v46, 920167782 }
  0xa9   :  { %v198_v52 = vsel %vm188_vm3, %v184_v47, 1326507024  ;;  %v189_v55 = vsel %vm185_vm1, %v169_v45, %v172_v41  ;;  %v191_v56 = vsel %vm187_vm4, %v175_v42, %v190_v48  ;;  %v195_v57 = vsel %vm187_vm4, %v178_v43, %v194_v51 }
  0xaa   :  { %v199_v58 = vsel %vm187_vm4, %v181_v46, %v198_v52  ;;  %v196_v59 = vsel %vm186_vm2, %v193_v49, %v195_v57  ;;  %vm319_vm5 = vcmp.gt.s32.totalorder %v318_v54, 0  ;;  %v2155_v3 = vsel %vm186_vm2, %v189_v55, %v191_v56 }
  0xab   :  { %v200_v60 = vsel %vm186_vm2, %v197_v50, %v199_v58  ;;  %v226_v1 = vand.u32 65535, %v196_v59  ;;  %v227_v2 = vshrl.u32 %v196_v59, 16  ;;  %v320_v8 = vsel %vm319_vm5, %v318_v54, 0 }
  0xac   :  { %v204_v62 = vand.u32 65535, %v200_v60  ;;  %v205_v63 = vshrl.u32 %v200_v60, 16  ;;  %v2157_v9 = vshll.u32 %v316_v53, 8  ;;  %v322_v32 = vand.u32 31, %v320_v8 }
  0xad   :  { %v229_v12 = vmul.u32 %v227_v2, %v202_v22  ;;  %v230_v13 = vmul.u32 %v226_v1, %v203_v61  ;;  %v228_v19 = vmul.u32 %v226_v1, %v202_v22  ;;  %v231_v21 = vmul.u32 %v227_v2, %v203_v61 }
  0xae   :  { %v207_v4 = vmul.u32 %v205_v63, %v202_v22  ;;  %v208_v7 = vmul.u32 %v204_v62, %v203_v61  ;;  %v206_v10 = vmul.u32 %v204_v62, %v202_v22  ;;  %v209_v11 = vmul.u32 %v205_v63, %v203_v61 }
  0xaf   :  { %v232_v26 = vshll.u32 %v229_v12, 16  ;;  %v233_v28 = vshrl.u32 %v229_v12, 16  ;;  %v234_v30 = vshll.u32 %v230_v13, 16  ;;  %v235_v34 = vshrl.u32 %v230_v13, 16 }
  0xb0   :  { %v210_v17 = vshll.u32 %v207_v4, 16  ;;  %v211_v18 = vshrl.u32 %v207_v4, 16  ;;  %v212_v23 = vshll.u32 %v208_v7, 16  ;;  %v213_v24 = vshrl.u32 %v208_v7, 16 }
  0xb1   :  { %vm236_vm7 = vc.u32 %v228_v19, %v232_v26  ;;  %v238_v35 = vadd.s32 %v232_v26, %v228_v19  ;;  %v2161_v40 = vsub.s32 32, %v322_v32  ;;  %v2164_v42 = vshrl.u32 %v320_v8, 5 }
  0xb2   :  { %vm214_vm6 = vc.u32 %v206_v10, %v210_v17  ;;  %v216_v20 = vadd.s32 %v210_v17, %v206_v10  ;;  %v237_v38 = vsel %vm236_vm7, 1, %v1990_v0  ;;  %v325_v46 = vshll.u32 %v1991_v25, %v322_v32 }
  0xb3   :  { %v215_v33 = vsel %vm214_vm6, 1, %v1990_v0  ;;  %v239_v41 = vadd.s32 %v237_v38, %v231_v21  ;;  %vm240_vm9 = vc.u32 %v238_v35, %v234_v30  ;;  %v2167_v45 = vadd.s32 %v238_v35, %v234_v30 }
  0xb4   :  { %v217_v37 = vadd.s32 %v215_v33, %v209_v11  ;;  %vm218_vm8 = vc.u32 %v216_v20, %v212_v23  ;;  %v241_v44 = vsel %vm240_vm9, 1, %v1990_v0  ;;  %v326_v48 = vshrl.u32 %v1992_v27, %v2161_v40 }
  0xb5   :  { %v219_v22 = vsel %vm218_vm8, 1, %v1990_v0  ;;  %v243_v47 = vadd.s32 %v241_v44, %v239_v41  ;;  %v328_v49 = vshll.u32 %v1992_v27, %v322_v32  ;;  %v329_v50 = vshrl.u32 %v1993_v29, %v2161_v40 }
  0xb6   :  { %v221_v43 = vadd.s32 %v219_v22, %v217_v37  ;;  %v331_v52 = vshll.u32 %v1993_v29, %v322_v32  ;;  %v332_v53 = vshrl.u32 %v1994_v31, %v2161_v40  ;;  %v334_v54 = vshll.u32 %v1994_v31, %v322_v32 }
  0xb7   :  { %v244_v55 = vadd.s32 %v243_v47, %v233_v28  ;;  %v2179_v56 = vor.u32 %v326_v48, %v325_v46  ;;  %v2181_v57 = vor.u32 %v329_v50, %v328_v49  ;;  %v335_v58 = vshrl.u32 %v1995_v36, %v2161_v40 }
  0xb8   :  { %v222_v51 = vadd.s32 %v221_v43, %v211_v18  ;;  %v333_v59 = vor.u32 %v332_v53, %v331_v52  ;;  %v337_v60 = vshll.u32 %v1995_v36, %v322_v32  ;;  %v338_v29 = vshrl.u32 %v1996_v39, %v2161_v40 }
  0xb9   :  { %v245_v61 = vadd.s32 %v244_v55, %v235_v34  ;;  %v336_v62 = vor.u32 %v335_v58, %v334_v54  ;;  %v246_v31 = vmul.u32 %v2130_v15, %v2155_v3  ;;  %vm340_vm11 = vcmp.lt.s32.totalorder %v2164_v42, 1 }
  0xba   :  { %v2185_v27 = vadd.s32 %v222_v51, %v213_v24  ;;  %v339_v63 = vor.u32 %v338_v29, %v337_v60  ;;  %vm343_vm12 = vcmp.lt.s32.totalorder %v2164_v42, 4  ;;  %v348_v36 = vsel %vm340_vm11, %v2179_v56, %v2181_v57 }
  0xbb   :  { %v249_v1 = vadd.s32 1, %v245_v61  ;;  %v357_v39 = vand.u32 65535, %v2157_v9  ;;  %vm342_vm13 = vcmp.lt.s32.totalorder %v2164_v42, 3  ;;  %v349_v15 = vsel %vm343_vm12, %v336_v62, 920167782 }
  0xbc   :  { %vm248_vm10 = vc.u32 %v2185_v27, %v2167_v45  ;;  %v352_v2 = vsel %vm340_vm11, %v2181_v57, %v333_v59  ;;  %v353_v3 = vsel %vm343_vm12, %v339_v63, 1326507024  ;;  %vm341_vm14 = vcmp.lt.s32.totalorder %v2164_v42, 2 }
  0xbd   :  { %v250_v4 = vsel %vm248_vm10, %v249_v1, %v245_v61  ;;  %v350_v7 = vsel %vm342_vm13, %v333_v59, %v349_v15  ;;  %v354_v8 = vsel %vm342_vm13, %v336_v62, %v353_v3  ;;  %v358_v13 = vshrl.u32 %v2157_v9, 16 }
  0xbe   :  { %v251_v10 = vadd.s32 %v250_v4, %v246_v31  ;;  %v351_v11 = vsel %vm341_vm14, %v348_v36, %v350_v7  ;;  %v355_v12 = vsel %vm341_vm14, %v352_v2, %v354_v8  ;;  %v345_v54 = vsel %vm343_vm12, %v333_v59, 2102212464 }
  0xbf   :  { %v359_v17 = vand.u32 65535, %v355_v12  ;;  %v360_v18 = vshrl.u32 %v355_v12, 16  ;;  %v381_v19 = vand.u32 65535, %v351_v11  ;;  %v382_v21 = vshrl.u32 %v351_v11, 16 }
  0xc0   :  { %v252_v23 = vadd.s32 536870912, %v251_v10  ;;  %v324_v29 = vshrl.u32 %v1991_v25, %v2161_v40  ;;  %v346_v59 = vsel %vm342_vm13, %v2181_v57, %v345_v54  ;;  %v247_v8 = vadd.s32 %v2167_v45, %v2185_v27  ;;  %v772_v45 = vld [vmem:[%s2354_s5] sm:$0xf] }
  0xc1   :  { %v362_v24 = vmul.u32 %v360_v18, %v357_v39  ;;  %v363_v26 = vmul.u32 %v359_v17, %v358_v13  ;;  %v384_v20 = vmul.u32 %v382_v21, %v357_v39  ;;  %v361_v30 = vmul.u32 %v359_v17, %v357_v39 }
  0xc2   :  { %v2219_v28 = vshrl.u32 %v252_v23, 30  ;;  %v385_v33 = vmul.u32 %v381_v19, %v358_v13  ;;  %v364_v35 = vmul.u32 %v360_v18, %v358_v13  ;;  %v383_v37 = vmul.u32 %v381_v19, %v357_v39 }
  0xc3   :  { %v365_v32 = vshll.u32 %v362_v24, 16  ;;  %v387_v38 = vshll.u32 %v384_v20, 16  ;;  %v367_v22 = vshll.u32 %v363_v26, 16  ;;  %v386_v43 = vmul.u32 %v382_v21, %v358_v13 }
  0xc4   :  { %v254_v34 = vshll.u32 %v2219_v28, 30  ;;  %v389_v49 = vshll.u32 %v385_v33, 16  ;;  %v366_v55 = vshrl.u32 %v362_v24, 16  ;;  %v368_v61 = vshrl.u32 %v363_v26, 16  ;;  %v774_v26 = vld [vmem:[#allocation3] sm:$0xf] }
  0xc5   :  { %vm369_vm15 = vc.u32 %v361_v30, %v365_v32  ;;  %v371_v41 = vadd.s32 %v365_v32, %v361_v30  ;;  %vm391_vm0 = vc.u32 %v383_v37, %v387_v38  ;;  %v393_v47 = vadd.s32 %v387_v38, %v383_v37 }
  0xc6   :  { %v255_v44 = vsub.s32 %v251_v10, %v254_v34  ;;  %v370_v46 = vsel %vm369_vm15, 1, %v1990_v0  ;;  %v392_v50 = vsel %vm391_vm0, 1, %v1990_v0  ;;  %v388_v1 = vshrl.u32 %v384_v20, 16 }
  0xc7   :  { %v372_v48 = vadd.s32 %v370_v46, %v364_v35  ;;  %vm373_vm1 = vc.u32 %v371_v41, %v367_v22  ;;  %v394_v53 = vadd.s32 %v392_v50, %v386_v43  ;;  %vm395_vm3 = vc.u32 %v393_v47, %v389_v49 }
  0xc8   :  { %vm256_vm2 = vcmp.lt.s32.totalorder %v255_v44, 0  ;;  %v257_v51 = vsub.s32 0, %v255_v44  ;;  %v374_v52 = vsel %vm373_vm1, 1, %v1990_v0  ;;  %v396_v62 = vsel %vm395_vm3, 1, %v1990_v0 }
  0xc9   :  { %v376_v58 = vadd.s32 %v374_v52, %v372_v48  ;;  %v398_v36 = vadd.s32 %v396_v62, %v394_v53  ;;  %v344_v39 = vsel %vm340_vm11, %v324_v29, %v2179_v56  ;;  %v390_v3 = vshrl.u32 %v385_v33, 16 }
  0xca   :  { %v258_v60 = vsel %vm256_vm2, %v257_v51, %v255_v44  ;;  %v397_v25 = vadd.s32 %v393_v47, %v389_v49  ;;  %v347_v0 = vsel %vm341_vm14, %v344_v39, %v346_v59  ;;  %vm779_vm6 = vcmask 1043456  }
  0xcb   :  { %v259_v31 = vclz %v258_v60  ;;  %v377_v63 = vadd.s32 %v376_v58, %v366_v55  ;;  %v399_v4 = vadd.s32 %v398_v36, %v388_v1  ;;  %v401_v57 = vmul.u32 %v2157_v9, %v347_v0 }
  0xcc   :  { %v781_v30 = vsel %vm779_vm6, %v774_v26, 0  ;;  %v801_v9 = vsel %vm779_vm6, %v772_v45, 0  ;;  %vm155_vm7 = vcmp.lt.s32.totalorder %v2122_v5, 0  ;;  %vm2247_vm9 = vcmp.le.f32.partialorder %v153_v6, 0.7853982 }
  0xcd   :  { %v1499_v15 = vadd.s32 4294967294, %v259_v31  ;;  %v378_v2 = vadd.s32 %v377_v63, %v368_v61  ;;  %v400_v40 = vadd.s32 %v399_v4, %v390_v3  ;;  %790 = vmatpush.bf16.msra.mxu0 %v781_v30  ;;  %810 = vmatpush.bf16.msra.mxu2 %v801_v9  ;;  %v277_v59 = vsub.s32 4, %v2219_v28 }
  0xce   :  { %vm2259_vm11 = vcmp.le.f32.partialorder %v308_v16, 0.7853982  ;;  %vm310_vm12 = vcmp.lt.s32.totalorder %v2128_v14, 0  ;;  %vm296_vm13 = vweird.f32 %v2122_v5 }
  0xcf   :  { %vm1500_vm4 = vcmp.lt.s32.totalorder %v1499_v15, 0  ;;  %vm403_vm5 = vc.u32 %v378_v2, %v397_v25  ;;  %v404_v11 = vadd.s32 1, %v400_v40  ;;  %v402_v51 = vadd.s32 %v397_v25, %v378_v2 }
  0xd0   :  { %v262_v7 = vsel %vm1500_vm4, 0, %v1499_v15  ;;  %v278_v0 = vsel %vm155_vm7, %v277_v59, %v2219_v28 }
  0xd1   :  { %v263_v56 = vsub.s32 32, %v262_v7  ;;  %v267_v10 = vsub.s32 4294967266, %v262_v7  ;;  %v264_v12 = vshll.u32 %v255_v44, %v262_v7  ;;  %v405_v18 = vsel %vm403_vm5, %v404_v11, %v400_v40 }
  0xd2   :  { %v406_v19 = vadd.s32 %v405_v18, %v401_v57  ;;  %v280_v16 = vsel %vm2247_vm9, 0, %v278_v0 }
  0xd3   :  { %v265_v13 = vshrl.u32 %v247_v8, %v263_v56  ;;  %v268_v17 = vadd.s32 127, %v267_v10  ;;  %v607_v26 = vand.u32 3, %v280_v16 }
  0xd4   :  { %v407_v42 = vadd.s32 536870912, %v406_v19 }
  0xd5   :  { %v266_v21 = vor.u32 %v265_v13, %v264_v12  ;;  %v269_v23 = vshll.u32 %v268_v17, 23  ;;  %vm608_vm14 = vcmp.lt.s32.totalorder %v607_v26, 2  ;;  %vm609_vm15 = vcmp.eq.s32.totalorder %v607_v26, 0 }
  0xd6   :  { %v408_v20 = vshrl.u32 %v407_v42, 30  ;;  %vm612_vm0 = vcmp.eq.s32.totalorder %v607_v26, 2 }
  0xd7   :  { %v270_v24 = vor.u32 4788187, %v269_v23  ;;  %v273_v32 = vcvt.s32.f32 %v266_v21  ;;  %v297_v21 = vadd.s32 3, %v280_v16 }
  0xd8   :  { %v409_v33 = vshll.u32 %v408_v20, 30  ;;  %v432_v7 = vsub.s32 4, %v408_v20 }
  0xd9   :  { %v271_v27 = vand.u32 2147483647, %v270_v24  ;;  %v298_v9 = vand.u32 3, %v297_v21 }
  0xda   :  { %v410_v35 = vsub.s32 %v406_v19, %v409_v33  ;;  %v433_v57 = vsel %vm310_vm12, %v432_v7, %v408_v20 }
  0xdb   :  { %v274_v34 = vmul.f32 %v273_v32, %v271_v27  ;;  %v435_v28 = vsel %vm2259_vm11, 0, %v433_v57  ;;  %vm299_vm1 = vcmp.lt.s32.totalorder %v298_v9, 2  ;;  %vm300_vm2 = vcmp.eq.s32.totalorder %v298_v9, 0 }
  0xdc   :  { %vm411_vm8 = vcmp.lt.s32.totalorder %v410_v35, 0  ;;  %v412_v38 = vsub.s32 0, %v410_v35  ;;  %v452_v32 = vadd.s32 3, %v435_v28  ;;  %vm303_vm6 = vcmp.eq.s32.totalorder %v298_v9, 2  ;;  %v1535_v9 = vld [vmem:[%s2361_s12] sm:$0xf] }
  0xdd   :  { %v275_v37 = vxor.u32 2147483648, %v274_v34 }
  0xde   :  { %v413_v44 = vsel %vm411_vm8, %v412_v38, %v410_v35 }
  0xdf   :  { %v276_v41 = vsel %vm155_vm7, %v275_v37, %v274_v34  ;;  %v414_v47 = vclz %v413_v44 }
  0xe0   :  { %v279_v43 = vsel %vm2247_vm9, %v2122_v5, %v276_v41  ;;  %v453_v41 = vand.u32 3, %v452_v32  ;;  %v883_v32 = vld [vmem:[%s2359_s10] sm:$0xf] }
  0xe1   :  { %v281_v46 = vmul.f32 %v279_v43, %v279_v43  ;;  %v1502_v48 = vadd.s32 4294967294, %v414_v47  ;;  %930 = vst [vmem:[#allocation1] ss:$4 sm:$0xff] %v883_v32  ;;  %v1571_v32 = vld [vmem:[#allocation9 + $0x38] sm:$0xf0] }
  0xe2   :  { %vm454_vm7 = vcmp.lt.s32.totalorder %v453_v41, 2  ;;  %vm455_vm8 = vcmp.eq.s32.totalorder %v453_v41, 0  ;;  %vm458_vm9 = vcmp.eq.s32.totalorder %v453_v41, 2 }
  0xe3   :  { %vm1503_vm10 = vcmp.lt.s32.totalorder %v1502_v48, 0  ;;  %v289_v49 = vmul.f32 -0.00019511016, %v281_v46  ;;  %v282_v61 = vmul.f32 -0.001358992, %v281_v46 }
  0xe4   :  { %v417_v50 = vsel %vm1503_vm10, 0, %v1502_v48  ;;  %vm451_vm10 = vweird.f32 %v2128_v14 }
  0xe5   :  { %v418_v52 = vsub.s32 32, %v417_v50  ;;  %v422_v6 = vsub.s32 4294967266, %v417_v50  ;;  %v419_v53 = vshll.u32 %v410_v35, %v417_v50  ;;  %v290_v58 = vadd.f32 0.008332121, %v289_v49 }
  0xe6   :  { %v283_v36 = vadd.f32 0.041655596, %v282_v61  ;;  %v761_v35 = vand.u32 3, %v435_v28 }
  0xe7   :  { %v420_v54 = vshrl.u32 %v402_v51, %v418_v52  ;;  %v423_v55 = vadd.s32 127, %v422_v6  ;;  %v291_v31 = vmul.f32 %v290_v58, %v281_v46 }
  0xe8   :  { %v284_v2 = vmul.f32 %v283_v36, %v281_v46  ;;  %vm762_vm3 = vcmp.lt.s32.totalorder %v761_v35, 2  ;;  %vm763_vm4 = vcmp.eq.s32.totalorder %v761_v35, 0  ;;  %vm766_vm5 = vcmp.eq.s32.totalorder %v761_v35, 2 }
  0xe9   :  { %v421_v60 = vor.u32 %v420_v54, %v419_v53  ;;  %v424_v29 = vshll.u32 %v423_v55, 23  ;;  %v292_v15 = vadd.f32 -0.16666654, %v291_v31 }
  0xea   :  { %v285_v10 = vadd.f32 -0.4999988, %v284_v2  ;;  %v1736_v2 = vld [vmem:[%s2357_s8 + $0x8] sm:$0xff] }
  0xeb   :  { %v425_v62 = vor.u32 4788187, %v424_v29  ;;  %v428_v1 = vcvt.s32.f32 %v421_v60  ;;  %v293_v40 = vmul.f32 %v292_v15, %v281_v46  ;;  %872 = vmatpush.bf16.msrb.mxu2 %v1736_v2 }
  0xec   :  { %v286_v17 = vmul.f32 %v285_v10, %v281_v46 }
  0xed   :  { %v426_v63 = vand.u32 2147483647, %v425_v62  ;;  %v294_v11 = vadd.f32 1.0, %v293_v40  ;;  %v1735_v40 = vld [vmem:[%s2357_s8] sm:$0xff] }
  0xee   :  { %v287_v30 = vadd.f32 1.0, %v286_v17 }
  0xef   :  { %v429_v39 = vmul.f32 %v428_v1, %v426_v63  ;;  %v295_v23 = vmul.f32 %v294_v11, %v279_v43  ;;  %873 = vmatpush.bf16.msrb.mxu2 %v1735_v40 }
  0xf0   :  { %v304_v37 = vxor.u32 2147483648, %v287_v30 }
  0xf1   :  { %v430_v3 = vxor.u32 2147483648, %v429_v39  ;;  %v301_v33 = vxor.u32 2147483648, %v295_v23 }
  0xf2   :  { %v614_v49 = vsel %vm612_vm0, %v304_v37, %v295_v23  ;;  %v305_v50 = vsel %vm303_vm6, %v304_v37, %v295_v23  ;;  %v1523_v37 = vld [vmem:[%s2360_s11] sm:$0xf]  ;;  %vm938_vm0 = vcmask 1041408  }
  0xf3   :  { %v431_v25 = vsel %vm310_vm12, %v430_v3, %v429_v39  ;;  %v611_v46 = vsel %vm609_vm15, %v287_v30, %v301_v33  ;;  %v302_v47 = vsel %vm300_vm2, %v287_v30, %v301_v33  ;;  %v1814_v39 = vld [vmem:[#allocation6] ss:$0 sm:$0xff]  ;;  %vm862_vm12 = vcmask 261120   ;;  %v1737_v30 = vld [vmem:[%s2360_s11 + $0x4] sm:$0xf] }
  0xf4   :  { %v434_v8 = vsel %vm2259_vm11, %v2128_v14, %v431_v25  ;;  %v615_v51 = vsel %vm608_vm14, %v611_v46, %v614_v49  ;;  %v306_v52 = vsel %vm299_vm1, %v302_v47, %v305_v50  ;;  %vm775_vm11 = vcmask 64512   ;;  %v1740_v33 = vld [vmem:[%s2361_s12 + $0x4] sm:$0x30]  ;;  %v1739_v49 = vld [vmem:[%s2361_s12 + $0x4] sm:$0xf] }
  0xf5   :  { %v436_v56 = vmul.f32 %v434_v8, %v434_v8  ;;  %v616_v29 = vsel %vm296_vm13, nan, %v615_v51  ;;  %v307_v62 = vsel %vm296_vm13, nan, %v306_v52  ;;  %vm990_vm13 = vcmask 1044480   ;;  %v974_v46 = vld [vmem:[%s2352_s3 + $0x8] sm:$0xff]  ;;  %v880_v51 = vld [vmem:[%s2378_s14] sm:$0xff] }
  0xf6   :  { %vm991_vm14 = vcmask 1045504   ;;  %vm937_vm15 = vcmask 1040384   ;;  %vm986_vm1 = vcmask 89088   ;;  %v881_v52 = vld [vmem:[%s2378_s14 + $0x8] sm:$0xff]  ;;  %vm933_vm2 = vcmask 23552  }
  0xf7   :  { %v437_v12 = vmul.f32 -0.001358992, %v436_v56  ;;  %v444_v13 = vmul.f32 -0.00019511016, %v436_v56 }
  0xf9   :  { %v438_v18 = vadd.f32 0.041655596, %v437_v12  ;;  %v445_v19 = vadd.f32 0.008332121, %v444_v13 }
  0xfb   :  { %v439_v42 = vmul.f32 %v438_v18, %v436_v56  ;;  %v446_v24 = vmul.f32 %v445_v19, %v436_v56 }
  0xfd   :  { %v440_v45 = vadd.f32 -0.4999988, %v439_v42  ;;  %v447_v27 = vadd.f32 -0.16666654, %v446_v24 }
  0xff   :  { %v441_v20 = vmul.f32 %v440_v45, %v436_v56  ;;  %v448_v34 = vmul.f32 %v447_v27, %v436_v56  ;;  %v1525_v45 = vld [vmem:[%s2360_s11 + $0x8] sm:$0xf0] }
 0x100   :  { %v1528_v27 = vor.u32 %v1737_v30, %v1525_v45  ;;  %v1772_v30 = vld [vmem:[#allocation9 + $0xf4] sm:$0xf0]  ;;  %v1747_v45 = vld [vmem:[#allocation9 + $0x34] sm:$0xf] }
 0x101   :  { %v442_v38 = vadd.f32 1.0, %v441_v20  ;;  %v449_v22 = vadd.f32 1.0, %v448_v34  ;;  %v1536_v20 = vor.u32 %v1740_v33, %v1535_v9  ;;  %v1997_v34 = vmov 65535   ;;  %v1771_v9 = vld [vmem:[#allocation9 + $0xf4] sm:$0xf] }
 0x102   :  { %922 = vmatpush.bf16.msrb.mxu0 %v1528_v27  ;;  %v992_v35 = vsel %vm990_vm13, 4294967295, %v1997_v34  ;;  %v939_v47 = vsel %vm937_vm15, 4294967295, %v1997_v34  ;;  %v1667_v33 = vld [vmem:[#allocation9 + $0xf8] sm:$0xf0] }
 0x103   :  { %v450_v43 = vmul.f32 %v449_v22, %v434_v8  ;;  %v459_v44 = vxor.u32 2147483648, %v442_v38  ;;  %v993_v22 = vsel %vm991_vm14, %v992_v35, 0  ;;  %v940_v50 = vsel %vm938_vm0, %v939_v47, 0  ;;  %v1561_v35 = vld [vmem:[#allocation9 + $0x20] sm:$0xf] }
 0x104   :  { %v1670_v34 = vor.u32 %v1771_v9, %v1667_v33  ;;  %v1757_v9 = vld [vmem:[#allocation9 + $0x84] sm:$0xf] }
 0x105   :  { %v456_v48 = vxor.u32 2147483648, %v450_v43  ;;  %v768_v53 = vsel %vm766_vm5, %v459_v44, %v450_v43  ;;  %v460_v55 = vsel %vm458_vm9, %v459_v44, %v450_v43  ;;  %v995_v43 = vand.u32 %v1536_v20, %v993_v22  ;;  %v973_v44 = vld [vmem:[%s2352_s3] sm:$0xff] }
 0x106   :  { %v1574_v20 = vor.u32 %v1747_v45, %v1571_v32  ;;  %v1758_v32 = vld [vmem:[#allocation9 + $0x84] sm:$0xf0] }
 0x107   :  { %v765_v6 = vsel %vm763_vm4, %v442_v38, %v456_v48  ;;  %v457_v54 = vsel %vm455_vm8, %v442_v38, %v456_v48  ;;  %v1738_v38 = vld [vmem:[%s2360_s11 + $0x4] sm:$0xf0]  ;;  %v975_v48 = vpack.c.bf16 %v974_v46, %v973_v44  ;;  %v1563_v44 = vld [vmem:[#allocation9 + $0x28] sm:$0xf0] }
 0x108   :  { %v769_v58 = vsel %vm762_vm3, %v765_v6, %v768_v53  ;;  %v461_v60 = vsel %vm454_vm7, %v457_v54, %v460_v55  ;;  %v1524_v41 = vor.u32 %v1738_v38, %v1523_v37  ;;  %v1537_v6 = vld [vmem:[%s2361_s12 + $0x8] sm:$0x30]  ;;  %v931_v54 = vld.sshfl [vmem:[#allocation1] sm:$0xff pattern:$0x73625140]  ;;  %vm897_vm3 = vcmask 130048  }
 0x109   :  { %v770_v61 = vsel %vm451_vm10, nan, %v769_v58  ;;  %v462_v31 = vsel %vm451_vm10, nan, %v461_v60  ;;  %v932_v53 = vld.sshfl [vmem:[#allocation1 + $0x8] sm:$0xff pattern:$0x73625140]  ;;  %v1540_v55 = vor.u32 %v1739_v49, %v1537_v6  ;;  %v941_v60 = vand.u32 %v940_v50, %v931_v54 }
 0x10a   :  { %v773_v63 = vpack.c.bf16 %v770_v61, %v616_v29  ;;  %v771_v1 = vpack.c.bf16 %v462_v31, %v307_v62  ;;  %908 = vmatpush.bf16.msra.mxu3 %v1524_v41  ;;  %v943_v58 = vand.u32 %v940_v50, %v932_v53  ;;  %v882_v29 = vpack.c.bf16 %v881_v52, %v880_v51  ;;  %v1601_v62 = vld [vmem:[#allocation9 + $0x70] sm:$0xf]  ;;  %v1756_v31 = vld [vmem:[#allocation9 + $0x74] sm:$0xf0]  ;;  %v1746_v37 = vld [vmem:[#allocation9 + $0x24] sm:$0xf0] }
 0x10b   :  { %v998_v61 = vand.u32 %v1540_v55, %v993_v22  ;;  %952 = vmatpush.bf16.msra.mxu1 %v941_v60  ;;  %v1657_v38 = vld [vmem:[#allocation9 + $0xe0] sm:$0xf]  ;;  %v1562_v22 = vor.u32 %v1746_v37, %v1561_v35  ;;  %v1770_v41 = vld [vmem:[#allocation9 + $0xe4] sm:$0xf0]  ;;  %v1659_v49 = vld [vmem:[#allocation9 + $0xe8] sm:$0xf0] }
 0x10c   :  { %1510 = vmatmul.msk.bf16.vlgmr.msra.gmra.mxu0 %vm775_vm11, %v773_v63  ;;  %1511 = vmatmul.msk.bf16.vlgmr.msra.gmra.mxu2 %vm775_vm11, %v771_v1  ;;  %v1755_v63 = vld [vmem:[#allocation9 + $0x74] sm:$0xf]  ;;  %v1602_v1 = vor.u32 %v1756_v31, %v1601_v62  ;;  %v1658_v46 = vor.u32 %v1770_v41, %v1657_v38  ;;  %v1553_v51 = vld [vmem:[#allocation9 + $0x10] sm:$0xf]  ;;  %v1744_v52 = vld [vmem:[#allocation9 + $0x14] sm:$0xf0] }
 0x10d   :  { %1007 = vmatpush.bf16.msra.mxu2 %v995_v43  ;;  %1021 = vmatpush.bf16.msra.mxu0 %v998_v61  ;;  %v1745_v43 = vld [vmem:[#allocation9 + $0x24] sm:$0xf]  ;;  %v1649_v6 = vld [vmem:[#allocation9 + $0xd0] sm:$0xf]  ;;  %v1554_v53 = vor.u32 %v1744_v52, %v1553_v51  ;;  %v1768_v54 = vld [vmem:[#allocation9 + $0xd4] sm:$0xf0] }
 0x10e   :  { %966 = vmatpush.bf16.msrb.mxu3 %v943_v58  ;;  %1531 = vmatmul.msk.bf16.vlgmr.msra.gmra.mxu1 %vm933_vm2, %v882_v29  ;;  %v1566_v47 = vor.u32 %v1745_v43, %v1563_v44  ;;  %v1743_v55 = vld [vmem:[#allocation9 + $0x14] sm:$0xf]  ;;  %v1555_v58 = vld [vmem:[#allocation9 + $0x18] sm:$0xf0]  ;;  %v1650_v60 = vor.u32 %v1768_v54, %v1649_v6  ;;  %v1032_v37 = vld [vmem:[%s2362_s13] sm:$0x3] }
 0x10f   :  { %1246 = vmatpush.bf16.msrb.mxu1 %v1602_v1  ;;  %v1767_v61 = vld [vmem:[#allocation9 + $0xd4] sm:$0xf]  ;;  %v1651_v62 = vld [vmem:[#allocation9 + $0xd8] sm:$0xf0]  ;;  %v1742_v1 = vld [vmem:[#allocation9 + $0x4] sm:$0xf0] }
 0x110   :  { %v1654_v31 = vor.u32 %v1767_v61, %v1651_v62  ;;  %v1034_v43 = vperm.slane %v1032_v37, 0 }
 0x189   :  { %v792_v36 = vpop.f32.mrf.mxu0 }
 0x18f   :  { %v812_v59 = vpop.f32.mrf.mxu2 }
 0x190   :  { %v813_v14 = vadd.f32 %v812_v59, %v792_v36  ;;  %v1603_v36 = vld [vmem:[#allocation9 + $0x78] sm:$0xf0]  ;;  %v1754_v59 = vld [vmem:[#allocation9 + $0x64] sm:$0xf0] }
 0x191   :  { %v794_v25 = vpop.f32.mrf.mxu0 }
 0x192   :  { %v821_v15 = vadd.f32 %v1814_v39, %v813_v14  ;;  %v1606_v14 = vor.u32 %v1755_v63, %v1603_v36  ;;  %v1545_v63 = vld [vmem:[#allocation9] sm:$0xf] }
 0x193   :  { %v1641_v36 = vld [vmem:[#allocation9 + $0xc0] sm:$0xf] }
 0x194   :  { %v823_v3 = vmin.f32 %v821_v15, 20.0 }
 0x196   :  { %v825_v4 = vmul.f32 1.442695, %v823_v3  ;;  %v1595_v3 = vld [vmem:[#allocation9 + $0x68] sm:$0xf0] }
 0x197   :  { %v814_v5 = vpop.f32.mrf.mxu2 }
 0x198   :  { %1817 = vpow2.f32 %v825_v4  ;;  %v815_v0 = vadd.f32 %v814_v5, %v794_v25  ;;  %v1815_v5 = vld [vmem:[#allocation8] ss:$0 sm:$0xff] }
 0x19a   :  { %v822_v7 = vadd.f32 %v1814_v39, %v815_v0  ;;  %v1593_v39 = vld [vmem:[#allocation9 + $0x60] sm:$0xf] }
 0x19b   :  { %v1594_v4 = vor.u32 %v1754_v59, %v1593_v39  ;;  %v1546_v39 = vor.u32 %v1742_v1, %v1545_v63  ;;  %v1766_v59 = vld [vmem:[#allocation9 + $0xc4] sm:$0xf0] }
 0x19c   :  { %v824_v8 = vmin.f32 %v822_v7, 20.0 }
 0x19d   :  { %1247 = vmatpush.bf16.msrb.mxu1 %v1594_v4  ;;  %v1765_v4 = vld [vmem:[#allocation9 + $0xc4] sm:$0xf] }
 0x19e   :  { %v1818_v56 = vpop.eup %1817  ;;  %v827_v10 = vmul.f32 1.442695, %v824_v8 }
 0x19f   :  { %v829_v16 = vadd.f32 2.0, %v1818_v56 }
 0x1a0   :  { %1819 = vpow2.f32 %v827_v10  ;;  %v1752_v10 = vld [vmem:[#allocation9 + $0x54] sm:$0xf0] }
 0x1a1   :  { %v831_v11 = vmul.f32 %v1818_v56, %v829_v16  ;;  %v1585_v56 = vld [vmem:[#allocation9 + $0x50] sm:$0xf]  ;;  %v1751_v16 = vld [vmem:[#allocation9 + $0x54] sm:$0xf] }
 0x1a3   :  { %v833_v57 = vadd.f32 2.0, %v831_v11 }
 0x1a5   :  { %1821 = vrcp.f32 %v833_v57  ;;  %v1587_v57 = vld [vmem:[#allocation9 + $0x58] sm:$0xf0] }
 0x1a6   :  { %v1820_v12 = vpop.eup %1819 }
 0x1a7   :  { %v830_v13 = vadd.f32 2.0, %v1820_v12 }
 0x1a9   :  { %v832_v17 = vmul.f32 %v1820_v12, %v830_v13  ;;  %v1590_v12 = vor.u32 %v1751_v16, %v1587_v57  ;;  %v1577_v13 = vld [vmem:[#allocation9 + $0x40] sm:$0xf]  ;;  %v1761_v57 = vld [vmem:[#allocation9 + $0xa4] sm:$0xf] }
 0x1aa   :  { %v1625_v16 = vld [vmem:[#allocation9 + $0xa0] sm:$0xf] }
 0x1ab   :  { %v834_v18 = vadd.f32 2.0, %v832_v17  ;;  %v1822_v19 = vpop.eup %1821 }
 0x1ac   :  { %v837_v28 = vmul.f32 %v1822_v19, %v831_v11  ;;  %v1586_v11 = vor.u32 %v1752_v10, %v1585_v56  ;;  %v1635_v56 = vld [vmem:[#allocation9 + $0xb8] sm:$0xf0] }
 0x1ad   :  { %1823 = vrcp.f32 %v834_v18  ;;  %v1749_v18 = vld [vmem:[#allocation9 + $0x44] sm:$0xf] }
 0x1ae   :  { %v839_v42 = vmul.f32 %v837_v28, %v821_v15  ;;  %v1753_v15 = vld [vmem:[#allocation9 + $0x64] sm:$0xf]  ;;  %1248 = vmatpush.bf16.msrb.mxu1 %v1586_v11  ;;  %v1579_v28 = vld [vmem:[#allocation9 + $0x48] sm:$0xf0]  ;;  %v1762_v11 = vld [vmem:[#allocation9 + $0xa4] sm:$0xf0] }
 0x1af   :  { %v1598_v25 = vor.u32 %v1753_v15, %v1595_v3  ;;  %v1547_v15 = vld [vmem:[#allocation9 + $0x8] sm:$0xf0]  ;;  %v1642_v3 = vor.u32 %v1766_v59, %v1641_v36 }
 0x1b3   :  { %v1824_v21 = vpop.eup %1823 }
 0x1b4   :  { %v838_v23 = vmul.f32 %v1824_v21, %v832_v17  ;;  %v1750_v17 = vld [vmem:[#allocation9 + $0x44] sm:$0xf0]  ;;  %v1582_v21 = vor.u32 %v1749_v18, %v1579_v28  ;;  %v1617_v28 = vld [vmem:[#allocation9 + $0x90] sm:$0xf] }
 0x1b5   :  { %v1578_v19 = vor.u32 %v1750_v17, %v1577_v13  ;;  %v1627_v13 = vld [vmem:[#allocation9 + $0xa8] sm:$0xf0] }
 0x1b6   :  { %v840_v24 = vmul.f32 %v838_v23, %v822_v7  ;;  %v1569_v23 = vld [vmem:[#allocation9 + $0x30] sm:$0xf]  ;;  %v1630_v17 = vor.u32 %v1761_v57, %v1627_v13  ;;  %v1773_v57 = vld [vmem:[#allocation11] sm:$0xff] }
 0x1b7   :  { %1249 = vmatpush.bf16.msrb.mxu1 %v1578_v19  ;;  %v954_v19 = vpop.f32.mrf.mxu1  ;;  %v1080_v13 = vld [vmem:[%s2364_s15] sm:$0x3] }
 0x1b8   :  { %v841_v26 = vpack.c.bf16 %v840_v24, %v839_v42  ;;  %v1748_v42 = vld [vmem:[#allocation9 + $0x34] sm:$0xf0] }
 0x1b9   :  { %v1570_v24 = vor.u32 %v1748_v42, %v1569_v23  ;;  %v1759_v23 = vld [vmem:[#allocation9 + $0x94] sm:$0xf] }
 0x1ba   :  { %1520 = vmatmul.msk.bf16.vlgmr.msrb.gmra.mxu2 %vm862_vm12, %v841_v26  ;;  %v1665_v26 = vld [vmem:[#allocation9 + $0xf0] sm:$0xf] }
 0x1bb   :  { %1274 = vmatpush.bf16.msrb.mxu2 %v1606_v14  ;;  %v1666_v27 = vor.u32 %v1772_v30, %v1665_v26  ;;  %1250 = vmatpush.bf16.msrb.mxu1 %v1570_v24  ;;  %v1741_v14 = vld [vmem:[#allocation9 + $0x4] sm:$0xf]  ;;  %v1619_v24 = vld [vmem:[#allocation9 + $0x98] sm:$0xf0] }
 0x1bc   :  { %v1622_v30 = vor.u32 %v1759_v23, %v1619_v24 }
 0x1bf   :  { %1275 = vmatpush.bf16.msrb.mxu2 %v1598_v25  ;;  %1251 = vmatpush.bf16.msrb.mxu1 %v1562_v22  ;;  %v1643_v25 = vld [vmem:[#allocation9 + $0xc8] sm:$0xf0]  ;;  %v956_v22 = vpop.f32.mrf.mxu1 }
 0x1c3   :  { %1276 = vmatpush.bf16.msrb.mxu2 %v1590_v12  ;;  %1252 = vmatpush.bf16.msrb.mxu1 %v1554_v53  ;;  %v1626_v12 = vor.u32 %v1762_v11, %v1625_v16  ;;  %v1781_v16 = vld [vmem:[#allocation11 + $0x40] sm:$0xff]  ;;  %v1774_v11 = vld [vmem:[#allocation11 + $0x8] sm:$0xff] }
 0x1c7   :  { %1277 = vmatpush.bf16.msrb.mxu2 %v1582_v21  ;;  %1253 = vmatpush.bf16.msrb.mxu1 %v1546_v39  ;;  %v1760_v21 = vld [vmem:[#allocation9 + $0x94] sm:$0xf0] }
 0x1c8   :  { %v1618_v42 = vor.u32 %v1760_v21, %v1617_v28 }
 0x1ca   :  { %1541 = vmatmul.msk.bf16.vlgmr.msra.gmra.mxu2 %vm986_vm1, %v975_v48 }
 0x1cb   :  { %1278 = vmatpush.bf16.msrb.mxu2 %v1574_v20  ;;  %v1611_v20 = vld [vmem:[#allocation9 + $0x88] sm:$0xf0] }
 0x1cf   :  { %1279 = vmatpush.bf16.msrb.mxu2 %v1566_v47 }
 0x23d   :  { %v875_v2 = vpop.f32.mrf.mxu2 }
 0x23e   :  { %v876_v40 = vadd.f32 %v1815_v5, %v875_v2  ;;  %v1550_v2 = vor.u32 %v1741_v14, %v1547_v15  ;;  %v1788_v14 = vld [vmem:[#allocation11 + $0x78] sm:$0xff]  ;;  %v1787_v15 = vld [vmem:[#allocation11 + $0x70] sm:$0xff] }
 0x245   :  { %v877_v0 = vpop.f32.mrf.mxu2 }
 0x246   :  { %v878_v7 = vadd.f32 %v1815_v5, %v877_v0  ;;  %v1646_v5 = vor.u32 %v1765_v4, %v1643_v25  ;;  %v1633_v0 = vld [vmem:[#allocation9 + $0xb0] sm:$0xf]  ;;  %v1785_v25 = vld [vmem:[#allocation11 + $0x60] sm:$0xff] }
 0x247   :  { %v1779_v4 = vld [vmem:[#allocation11 + $0x30] sm:$0xff] }
 0x248   :  { %v884_v8 = vpack.c.bf16 %v878_v7, %v876_v40  ;;  %v1764_v40 = vld [vmem:[#allocation9 + $0xb4] sm:$0xf0]  ;;  %v1763_v7 = vld [vmem:[#allocation9 + $0xb4] sm:$0xf] }
 0x249   :  { %v1638_v10 = vor.u32 %v1763_v7, %v1635_v56  ;;  %v1783_v7 = vld [vmem:[#allocation11 + $0x50] sm:$0xff]  ;;  %v1782_v56 = vld [vmem:[#allocation11 + $0x48] sm:$0xff] }
 0x24a   :  { %1529 = vmatmul.msk.bf16.vlgmr.msra.gmra.mxu3 %vm897_vm3, %v884_v8  ;;  %1530 = vmatmul.msk.bf16.vlgmr.msrb.gmra.mxu0 %vm897_vm3, %v884_v8  ;;  %v1634_v8 = vor.u32 %v1764_v40, %v1633_v0  ;;  %v1784_v0 = vld [vmem:[#allocation11 + $0x58] sm:$0xff]  ;;  %v1777_v40 = vld [vmem:[#allocation11 + $0x20] sm:$0xff] }
 0x24b   :  { %1260 = vmatpush.bf16.msra.mxu3 %v1666_v27  ;;  %1288 = vmatpush.bf16.msrb.mxu0 %v1670_v34  ;;  %v1609_v27 = vld [vmem:[#allocation9 + $0x80] sm:$0xf]  ;;  %v1614_v34 = vor.u32 %v1757_v9, %v1611_v20 }
 0x24c   :  { %v1610_v33 = vor.u32 %v1758_v32, %v1609_v27 }
 0x24d   :  { %v1009_v26 = vpop.f32.mrf.mxu2 }
 0x24f   :  { %1261 = vmatpush.bf16.msra.mxu3 %v1658_v46 }
 0x253   :  { %1262 = vmatpush.bf16.msra.mxu3 %v1650_v60  ;;  %v1035_v60 = vperm.slane %v1032_v37, 1 }
 0x255   :  { %v1011_v46 = vpop.f32.mrf.mxu2 }
 0x257   :  { %1263 = vmatpush.bf16.msra.mxu3 %v1642_v3  ;;  %v1780_v3 = vld [vmem:[#allocation11 + $0x38] sm:$0xff] }
 0x258   :  { %1440 = vmatpush.bf16.msra.mxu1 %v1780_v3 }
 0x25a   :  { %1532 = vmatmul.msk.bf16.vlgmr.msrb.gmra.mxu3 %vm933_vm2, %v882_v29  ;;  %1542 = vmatmul.msk.bf16.vlgmr.msra.gmra.mxu0 %vm986_vm1, %v975_v48  ;;  %v1769_v48 = vld [vmem:[#allocation9 + $0xe4] sm:$0xf]  ;;  %v1558_v29 = vor.u32 %v1743_v55, %v1555_v58 }
 0x25b   :  { %v1662_v50 = vor.u32 %v1769_v48, %v1659_v49  ;;  %1264 = vmatpush.bf16.msra.mxu3 %v1634_v8  ;;  %v1776_v8 = vld [vmem:[#allocation11 + $0x18] sm:$0xff] }
 0x25c   :  { %1280 = vmatpush.bf16.msrb.mxu2 %v1558_v29  ;;  %1441 = vmatpush.bf16.msra.mxu1 %v1779_v4 }
 0x25d   :  { %1289 = vmatpush.bf16.msrb.mxu0 %v1662_v50 }
 0x25f   :  { %1265 = vmatpush.bf16.msra.mxu3 %v1626_v12 }
 0x260   :  { %1281 = vmatpush.bf16.msrb.mxu2 %v1550_v2  ;;  %v1786_v2 = vld [vmem:[#allocation11 + $0x68] sm:$0xff] }
 0x261   :  { %1290 = vmatpush.bf16.msrb.mxu0 %v1654_v31 }
 0x263   :  { %1266 = vmatpush.bf16.msra.mxu3 %v1618_v42  ;;  %v1082_v42 = vperm.slane %v1080_v13, 0 }
 0x265   :  { %1291 = vmatpush.bf16.msrb.mxu0 %v1646_v5  ;;  %v1778_v5 = vld [vmem:[#allocation11 + $0x28] sm:$0xff] }
 0x266   :  { %1442 = vmatpush.bf16.msra.mxu1 %v1778_v5 }
 0x267   :  { %1267 = vmatpush.bf16.msra.mxu3 %v1610_v33 }
 0x269   :  { %1292 = vmatpush.bf16.msrb.mxu0 %v1638_v10  ;;  %v1775_v10 = vld [vmem:[#allocation11 + $0x10] sm:$0xff] }
 0x26a   :  { %1443 = vmatpush.bf16.msra.mxu1 %v1777_v40 }
 0x26b   :  { %1454 = vmatpush.bf16.msrb.mxu3 %v1788_v14 }
 0x26d   :  { %1293 = vmatpush.bf16.msrb.mxu0 %v1630_v17 }
 0x26e   :  { %1444 = vmatpush.bf16.msra.mxu1 %v1776_v8 }
 0x26f   :  { %1455 = vmatpush.bf16.msrb.mxu3 %v1787_v15 }
 0x271   :  { %1294 = vmatpush.bf16.msrb.mxu0 %v1622_v30 }
 0x272   :  { %1445 = vmatpush.bf16.msra.mxu1 %v1775_v10 }
 0x273   :  { %1456 = vmatpush.bf16.msrb.mxu3 %v1786_v2 }
 0x275   :  { %1295 = vmatpush.bf16.msrb.mxu0 %v1614_v34 }
 0x276   :  { %1446 = vmatpush.bf16.msra.mxu1 %v1774_v11 }
 0x277   :  { %1457 = vmatpush.bf16.msrb.mxu3 %v1785_v25 }
 0x27a   :  { %1447 = vmatpush.bf16.msra.mxu1 %v1773_v57 }
 0x27b   :  { %1458 = vmatpush.bf16.msrb.mxu3 %v1784_v0 }
 0x27f   :  { %1459 = vmatpush.bf16.msrb.mxu3 %v1783_v7 }
 0x283   :  { %1460 = vmatpush.bf16.msrb.mxu3 %v1782_v56 }
 0x287   :  { %1461 = vmatpush.bf16.msrb.mxu3 %v1781_v16 }
 0x2c7   :  { %v924_v18 = vpop.f32.mrf.mxu0 }
 0x2cd   :  { %v910_v45 = vpop.f32.mrf.mxu3 }
 0x2ce   :  { %v955_v35 = vadd.f32 %v954_v19, %v910_v45  ;;  %v1083_v19 = vperm.slane %v1080_v13, 1 }
 0x2cf   :  { %v926_v38 = vpop.f32.mrf.mxu0 }
 0x2d0   :  { %v1028_v41 = vadd.f32 %v1009_v26, %v955_v35 }
 0x2d2   :  { %v1038_v48 = vadd.f32 %v1034_v43, %v1028_v41 }
 0x2d4   :  { %v1042_v51 = vmax.f32 %v1038_v48, 0.0 }
 0x2d5   :  { %v912_v44 = vpop.f32.mrf.mxu3 }
 0x2d6   :  { %v957_v47 = vadd.f32 %v956_v22, %v912_v44  ;;  %v1816_v44 = vld [vmem:[%s2366_s17] ss:$0 sm:$0xff] }
 0x2d7   :  { %v1023_v6 = vpop.f32.mrf.mxu0 }
 0x2d8   :  { %v1030_v49 = vadd.f32 %v1011_v46, %v957_v47 }
 0x2da   :  { %v1040_v50 = vadd.f32 %v1034_v43, %v1030_v49 }
 0x2dc   :  { %v1044_v52 = vmax.f32 %v1040_v50, 0.0 }
 0x2dd   :  { %v968_v53 = vpop.f32.mrf.mxu3 }
 0x2de   :  { %v1046_v54 = vpack.c.bf16 %v1044_v52, %v1042_v51  ;;  %v969_v55 = vadd.f32 %v968_v53, %v924_v18 }
 0x2df   :  { %v1025_v62 = vpop.f32.mrf.mxu0 }
 0x2e0   :  { %1254 = vmatmul.bf16.vlgmr.msrb.gmra.mxu1 %v1046_v54  ;;  %1282 = vmatmul.bf16.vlgmr.msrb.gmra.mxu2 %v1046_v54  ;;  %v1029_v58 = vadd.f32 %v1023_v6, %v969_v55  ;;  %v1470_v54 = vstv %s2379_s9 }
 0x2e2   :  { %v1039_v31 = vadd.f32 %v1035_v60, %v1029_v58 }
 0x2e4   :  { %v1043_v36 = vmax.f32 %v1039_v31, 0.0 }
 0x2e5   :  { %v970_v29 = vpop.f32.mrf.mxu3 }
 0x2e6   :  { %v971_v61 = vadd.f32 %v970_v29, %v926_v38 }
 0x2e8   :  { %v1031_v63 = vadd.f32 %v1025_v62, %v971_v61 }
 0x2ea   :  { %v1041_v1 = vadd.f32 %v1035_v60, %v1031_v63 }
 0x2ec   :  { %v1045_v39 = vmax.f32 %v1041_v1, 0.0 }
 0x2ee   :  { %v1047_v59 = vpack.c.bf16 %v1045_v39, %v1043_v36 }
 0x2f0   :  { %1268 = vmatmul.bf16.vlgmr.msra.gmra.mxu3 %v1047_v59  ;;  %1296 = vmatmul.bf16.vlgmr.msrb.gmra.mxu0 %v1047_v59 }
 0x35d   :  { %v1255_v17 = vpop.f32.mrf.mxu1 }
 0x35e   :  { %v1256_v32 = vadd.f32 %v1255_v17, %v1082_v42 }
 0x363   :  { %v1283_v12 = vpop.f32.mrf.mxu2 }
 0x364   :  { %v1284_v21 = vadd.f32 %v1283_v12, %v1083_v19 }
 0x365   :  { %v1257_v27 = vpop.f32.mrf.mxu1 }
 0x366   :  { %v1258_v20 = vadd.f32 %v1257_v27, %v1082_v42 }
 0x36b   :  { %v1285_v28 = vpop.f32.mrf.mxu2 }
 0x36c   :  { %v1286_v24 = vadd.f32 %v1285_v28, %v1083_v19 }
 0x36d   :  { %v1297_v18 = vpop.f32.mrf.mxu0 }
 0x36e   :  { %v1298_v26 = vadd.f32 %v1297_v18, %v1284_v21 }
 0x370   :  { %v1303_v9 = vmax.f32 %v1298_v26, 0.0 }
 0x373   :  { %v1269_v23 = vpop.f32.mrf.mxu3 }
 0x374   :  { %v1270_v34 = vadd.f32 %v1269_v23, %v1256_v32 }
 0x375   :  { %v1299_v30 = vpop.f32.mrf.mxu0 }
 0x376   :  { %v1300_v45 = vadd.f32 %v1299_v30, %v1286_v24  ;;  %v1302_v22 = vmax.f32 %v1270_v34, 0.0 }
 0x378   :  { %v1305_v33 = vmax.f32 %v1300_v45, 0.0 }
 0x37a   :  { %v1307_v35 = vpack.c.bf16 %v1305_v33, %v1303_v9 }
 0x37b   :  { %v1271_v37 = vpop.f32.mrf.mxu3 }
 0x37c   :  { %v1272_v38 = vadd.f32 %v1271_v37, %v1258_v20  ;;  %1462 = vmatmul.bf16.vlgmr.msrb.gmra.mxu3 %v1307_v35 }
 0x37e   :  { %v1304_v41 = vmax.f32 %v1272_v38, 0.0 }
 0x380   :  { %v1306_v43 = vpack.c.bf16 %v1304_v41, %v1302_v22 }
 0x382   :  { %1448 = vmatmul.bf16.vlgmr.msra.gmra.mxu1 %v1306_v43 }
 0x3ff   :  { %v1449_v46 = vpop.f32.mrf.mxu1  ;;  %v1463_v47 = vpop.f32.mrf.mxu3 }
 0x400   :  { %v1450_v48 = vadd.f32 %v1816_v44, %v1449_v46 }
 0x402   :  { %v1464_v49 = vadd.f32 %v1463_v47, %v1450_v48 }
 0x404   :  { %1825 = vtanh.f32 %v1464_v49 }
 0x407   :  { %v1451_v50 = vpop.f32.mrf.mxu1  ;;  %v1465_v52 = vpop.f32.mrf.mxu3 }
 0x408   :  { %v1452_v51 = vadd.f32 %v1816_v44, %v1451_v50 }
 0x40a   :  { %v1466_v6 = vadd.f32 %v1465_v52, %v1452_v51  ;;  %v1826_v53 = vpop.eup %1825 }
 0x40b   :  { %v1471_v58 = vmul.f32 %v1826_v53, %v1470_v54 }
 0x40c   :  { %1827 = vtanh.f32 %v1466_v6 }
 0x412   :  { %v1828_v55 = vpop.eup %1827 }
 0x413   :  { %v1472_v60 = vmul.f32 %v1828_v55, %v1470_v54 }
 0x415   :  { %v1792_v29 = vpack.c.bf16 %v1472_v60, %v1471_v58 }
 0x417   :  { %1793 = vst [vmem:[#allocation12] sm:$0xff] %v1792_v29  }
 0x418   :  { %1489 = dma.vmem_to_hbm [thread:$0]  %s1482_s23, 128, %s1484_s25, [#allocation5], %s1988_s22, %s1988_s22, %s1989_s2  }
 0x419   :  { %1979 = dma.done.wait [#allocation5], 128  }
 0x41a   :  { %1980 = vsyncadd [#allocation5], 4294967168 }
 0x41b   :  { %1494 = vsyncpa [#allocation4], 1 }
 0x41c   :  { %1495 = vsyncpa [#allocation7], 1 }
 0x41d   :  { %1496 = vsyncpa [#allocation10], 1 }
 0x41e   :  { %1497 = vsyncpa [#allocation5], 1 }

</bundles_post_ra>
